<compile_context>
chip_gen: v5e
topology: v5e:2x2
jax: 0.10.0
libtpu: 0.0.40
codegen_flags: <defaults>
</compile_context>

<pallas_src>
import math
from functools import partial

import jax
import jax.numpy as jnp
from jax import lax
from jax.experimental import pallas as pl
from jax.experimental.pallas import tpu as pltpu


# ---------------------------------------------------------------------------
# in-kernel helpers (pure jnp/lax, traced into the kernel body, all f32)
# ---------------------------------------------------------------------------
def _layer_norm(x, w, b, eps=1e-5):
    mu = jnp.mean(x, axis=-1, keepdims=True)
    var = jnp.mean((x - mu) ** 2, axis=-1, keepdims=True)
    return (x - mu) * lax.rsqrt(var + eps) * w + b


def _gelu_exact(x):
    # matches torch.nn.GELU() default (erf-based, NOT the tanh approximation)
    return 0.5 * x * (1.0 + lax.erf(x * (1.0 / math.sqrt(2.0))))


# ---------------------------------------------------------------------------
# Pallas kernel: one transformer layer per grid step, activations resident in
# the output block across the (last, "arbitrary") depth axis.
# ---------------------------------------------------------------------------
def _transformer_layer_kernel(x_ref, ln1w_ref, ln1b_ref, wq_ref, wk_ref, wv_ref,
                              wo_ref, bo_ref, ln2w_ref, ln2b_ref,
                              w1_ref, b1_ref, w2_ref, b2_ref, o_ref):
    layer = pl.program_id(1)

    b_blk, n_tok, d_model = x_ref.shape
    heads, _, dh = wq_ref.shape[1:]
    rows = b_blk * n_tok
    bf16, f32 = jnp.bfloat16, jnp.float32

    # first layer: seed the resident activation block from the input
    @pl.when(layer == 0)
    def _():
        o_ref[...] = x_ref[...]

    x = o_ref[...].reshape(rows, d_model)                       # (R, D) f32

    # ---------------- Residual(PreNorm(Attention)), mask=None path ----------
    xn = _layer_norm(x, ln1w_ref[0], ln1b_ref[0])
    xn_b = xn.astype(bf16)

    wq = wq_ref[0]                                              # (H, D, dh) bf16
    wk = wk_ref[0]
    wv = wv_ref[0]
    wo = wo_ref[0]                                              # (H, dh, D) bf16

    parts = []
    for bi in range(b_blk):                                     # static, usually 1
        xb = xn_b[bi * n_tok:(bi + 1) * n_tok]                  # (N, D)
        xh = jnp.broadcast_to(xb, (heads, n_tok, d_model))      # (H, N, D)
        # per-head projections as one batched matmul each (heads = batch dim)
        q = jnp.einsum('hnk,hkd->hnd', xh, wq, preferred_element_type=f32)
        k = jnp.einsum('hnk,hkd->hnd', xh, wk, preferred_element_type=f32)
        v = jnp.einsum('hnk,hkd->hnd', xh, wv, preferred_element_type=f32)
        # attention scores; scale already folded into wq in the wrapper
        dots = jnp.einsum('hnd,hmd->hnm', q.astype(bf16), k.astype(bf16),
                          preferred_element_type=f32)           # (H, N, N)
        m = jnp.max(dots, axis=-1, keepdims=True)
        e = jnp.exp(dots - m)
        attn = e * pl.reciprocal(jnp.sum(e, axis=-1, keepdims=True), approx=True)
        ctx = jnp.einsum('hnm,hmd->hnd', attn.astype(bf16), v.astype(bf16),
                         preferred_element_type=f32)            # (H, N, dh)
        # output projection folded per head, then reduced over heads
        proj = jnp.einsum('hnd,hdk->hnk', ctx.astype(bf16), wo,
                          preferred_element_type=f32)           # (H, N, D)
        parts.append(jnp.sum(proj, axis=0))                     # (N, D)
    attn_out = parts[0] if b_blk == 1 else jnp.concatenate(parts, axis=0)
    x = x + attn_out + bo_ref[0]

    # ---------------- Residual(PreNorm(FeedForward)) -------------------------
    xn2 = _layer_norm(x, ln2w_ref[0], ln2b_ref[0])
    hid = jnp.dot(xn2.astype(bf16), w1_ref[0],
                  preferred_element_type=f32) + b1_ref[0]
    hid = _gelu_exact(hid)
    ff = jnp.dot(hid.astype(bf16), w2_ref[0],
                 preferred_element_type=f32) + b2_ref[0]

    o_ref[...] = (x + ff).reshape(b_blk, n_tok, d_model)


# ---------------------------------------------------------------------------
# one-time parameter preparation: transpose / head-reshape / bf16-cast / stack
# ---------------------------------------------------------------------------
def prepare_params(params, heads):
    dim = params[0]["wqkv"].shape[1]
    dh = dim // heads
    scale = dim ** (-0.5)   # NOTE: module scales by dim**-0.5 (not head_dim**-0.5)

    def stack(fn):
        return jnp.stack([fn(p) for p in params], axis=0)

    def head_w(w, s=1.0):
        # torch Linear rows are output features ordered (head, dh):
        # (D_out, D_in) -> (H, D_in, dh)
        return (jnp.transpose(w.reshape(heads, dh, dim), (0, 2, 1)) * s).astype(jnp.bfloat16)

    return {
        "ln1w": stack(lambda p: p["ln1_w"]),
        "ln1b": stack(lambda p: p["ln1_b"]),
        "wq": stack(lambda p: head_w(p["wqkv"][:dim], scale)),          # scale folded in
        "wk": stack(lambda p: head_w(p["wqkv"][dim:2 * dim])),
        "wv": stack(lambda p: head_w(p["wqkv"][2 * dim:])),
        "wo": stack(lambda p: p["wo"].T.reshape(heads, dh, dim).astype(jnp.bfloat16)),
        "bo": stack(lambda p: p["bo"]),
        "ln2w": stack(lambda p: p["ln2_w"]),
        "ln2b": stack(lambda p: p["ln2_b"]),
        "w1": stack(lambda p: p["w1"].T.astype(jnp.bfloat16)),          # (D, mlp)
        "b1": stack(lambda p: p["b1"]),
        "w2": stack(lambda p: p["w2"].T.astype(jnp.bfloat16)),          # (mlp, D)
        "b2": stack(lambda p: p["b2"]),
    }


# ---------------------------------------------------------------------------
# wrapper: single fused pallas_call over (batch_blocks, depth)
# ---------------------------------------------------------------------------
@partial(jax.jit, static_argnames=("block_b",))
def transformer_forward(x, sp, block_b=1):
    B, N, D = x.shape
    L, H, _, dh = sp["wq"].shape
    mlp = sp["w1"].shape[-1]
    assert B % block_b == 0

    def wmap(nd):
        return lambda bb, l: (l,) + (0,) * nd

    in_specs = [
        pl.BlockSpec((block_b, N, D), lambda bb, l: (bb, 0, 0)),   # x (read at layer 0)
        pl.BlockSpec((1, 1, D), wmap(2)),        # ln1 w
        pl.BlockSpec((1, 1, D), wmap(2)),        # ln1 b
        pl.BlockSpec((1, H, D, dh), wmap(3)),    # wq (scale folded, bf16)
        pl.BlockSpec((1, H, D, dh), wmap(3)),    # wk
        pl.BlockSpec((1, H, D, dh), wmap(3)),    # wv
        pl.BlockSpec((1, H, dh, D), wmap(3)),    # wo
        pl.BlockSpec((1, 1, D), wmap(2)),        # bo
        pl.BlockSpec((1, 1, D), wmap(2)),        # ln2 w
        pl.BlockSpec((1, 1, D), wmap(2)),        # ln2 b
        pl.BlockSpec((1, D, mlp), wmap(2)),      # w1^T
        pl.BlockSpec((1, 1, mlp), wmap(2)),      # b1
        pl.BlockSpec((1, mlp, D), wmap(2)),      # w2^T
        pl.BlockSpec((1, 1, D), wmap(2)),        # b2
    ]

    return pl.pallas_call(
        _transformer_layer_kernel,
        out_shape=jax.ShapeDtypeStruct((B, N, D), jnp.float32),
        grid=(B // block_b, L),
        in_specs=in_specs,
        out_specs=pl.BlockSpec((block_b, N, D), lambda bb, l: (bb, 0, 0)),
        compiler_params=pltpu.CompilerParams(
            dimension_semantics=("parallel", "arbitrary"),
            # At real ViT sizes (D>=768, mlp>=3072) raise vmem_limit_bytes here so
            # whole-layer bf16 weights stay resident (esp. on 128 MiB v5e/v6e).
        ),
    )(x, sp["ln1w"], sp["ln1b"], sp["wq"], sp["wk"], sp["wv"], sp["wo"], sp["bo"],
      sp["ln2w"], sp["ln2b"], sp["w1"], sp["b1"], sp["w2"], sp["b2"])


# ---------------------------------------------------------------------------
# deterministic parameter init (shapes follow the nn.Module __init__)
# ---------------------------------------------------------------------------
def init_params(key, dim, depth, heads, mlp_dim):
    params = []
    for d in range(depth):
        keys = jax.random.split(jax.random.fold_in(key, d), 8)
        p = {
            "ln1_w": 1.0 + 0.05 * jax.random.normal(keys[0], (1, dim), jnp.float32),
            "ln1_b": 0.02 * jax.random.normal(keys[1], (1, dim), jnp.float32),
            "wqkv": jax.random.normal(keys[2], (3 * dim, dim), jnp.float32) / math.sqrt(dim),
            "wo": jax.random.normal(keys[3], (dim, dim), jnp.float32) / math.sqrt(dim),
            "bo": 0.02 * jax.random.normal(keys[4], (1, dim), jnp.float32),
            "ln2_w": 1.0 + 0.05 * jax.random.normal(keys[5], (1, dim), jnp.float32),
            "ln2_b": jnp.zeros((1, dim), jnp.float32),
            "w1": jax.random.normal(keys[6], (mlp_dim, dim), jnp.float32) / math.sqrt(dim),
            "b1": 0.02 * jax.random.normal(keys[7], (1, mlp_dim), jnp.float32),
            "w2": jax.random.normal(jax.random.fold_in(keys[7], 1),
                                    (dim, mlp_dim), jnp.float32) / math.sqrt(mlp_dim),
            "b2": jnp.zeros((1, dim), jnp.float32),
        }
        params.append(p)
    return params


# ---------------------------------------------------------------------------
# pure-JAX f32 reference (mirrors the PyTorch forward, mask=None)
# ---------------------------------------------------------------------------
def reference_forward(x, params, heads, dim):
    scale = dim ** (-0.5)
    for p in params:
        B, N, D = x.shape
        dh = D // heads
        xn = _layer_norm(x, p["ln1_w"][0], p["ln1_b"][0])
        qkv = xn @ p["wqkv"].T
        q, k, v = jnp.split(qkv, 3, axis=-1)
        rearr = lambda t: t.reshape(B, N, heads, dh).transpose(0, 2, 1, 3)
        q, k, v = rearr(q), rearr(k), rearr(v)
        dots = jnp.einsum("bhid,bhjd->bhij", q, k) * scale
        attn = jax.nn.softmax(dots, axis=-1)
        out = jnp.einsum("bhij,bhjd->bhid", attn, v)
        out = out.transpose(0, 2, 1, 3).reshape(B, N, D)
        out = out @ p["wo"].T + p["bo"][0]
        x = x + out
        xn2 = _layer_norm(x, p["ln2_w"][0], p["ln2_b"][0])
        hid = _gelu_exact(xn2 @ p["w1"].T + p["b1"][0])
        ff = hid @ p["w2"].T + p["b2"][0]
        x = x + ff
    return x


# TODO(synk): mask != None path (boolean attention mask with F.pad) is not
# implemented; the module's default forward (mask=None) is reproduced exactly.

if __name__ == "__main__":
    # small shapes: Transformer(dim=32, depth=2, heads=8, mlp_dim=64), x: (2, 8, 32)
    B, N, dim, depth, heads, mlp_dim = 2, 8, 32, 2, 8, 64

    key = jax.random.PRNGKey(0)
    kx, kp = jax.random.split(key)
    x = jax.random.normal(kx, (B, N, dim), jnp.float32)
    params = init_params(kp, dim, depth, heads, mlp_dim)
    stacked = prepare_params(params, heads)

    ref = jax.block_until_ready(reference_forward(x, params, heads, dim))

    # block_b=1: batch axis is a size-2 "parallel" grid axis (shards across v7x's 2 TCs)
    out = jax.block_until_ready(transformer_forward(x, stacked, block_b=1))
    assert out.shape == (B, N, dim)
    err1 = float(jnp.max(jnp.abs(out - ref)))
    assert err1 < 5e-2, f"mismatch vs reference (block_b=1): {err1}"

    # block_b=B: whole batch per grid step (larger matmul M per step)
    out2 = jax.block_until_ready(transformer_forward(x, stacked, block_b=B))
    err2 = float(jnp.max(jnp.abs(out2 - ref)))
    assert err2 < 5e-2, f"mismatch vs reference (block_b=B): {err2}"

    print("KERNEL_OK")
</pallas_src>

<mosaic_0001>
module attributes {stable_mosaic.version = 11 : i64} {
  func.func @_transformer_layer_kernel(%arg0: i32, %arg1: i32, %arg2: memref<1x8x32xf32, #tpu.memory_space<vmem>>, %arg3: memref<1x1x32xf32, #tpu.memory_space<vmem>>, %arg4: memref<1x1x32xf32, #tpu.memory_space<vmem>>, %arg5: memref<1x8x32x4xbf16, #tpu.memory_space<vmem>>, %arg6: memref<1x8x32x4xbf16, #tpu.memory_space<vmem>>, %arg7: memref<1x8x32x4xbf16, #tpu.memory_space<vmem>>, %arg8: memref<1x8x4x32xbf16, #tpu.memory_space<vmem>>, %arg9: memref<1x1x32xf32, #tpu.memory_space<vmem>>, %arg10: memref<1x1x32xf32, #tpu.memory_space<vmem>>, %arg11: memref<1x1x32xf32, #tpu.memory_space<vmem>>, %arg12: memref<1x32x64xbf16, #tpu.memory_space<vmem>>, %arg13: memref<1x1x64xf32, #tpu.memory_space<vmem>>, %arg14: memref<1x64x32xbf16, #tpu.memory_space<vmem>>, %arg15: memref<1x1x32xf32, #tpu.memory_space<vmem>>, %arg16: memref<1x8x32xf32, #tpu.memory_space<vmem>>) attributes {dimension_semantics = [#tpu.dimension_semantics<parallel>, #tpu.dimension_semantics<arbitrary>], iteration_bounds = array<i64: 2, 2>, scalar_prefetch = 0 : i64, scratch_operands = 0 : i64, tpu.core_type = #tpu.core_type<tc>, window_params = [{transform_indices = @transform_0, window_bounds = array<i64: 1, 8, 32>}, {transform_indices = @transform_1, window_bounds = array<i64: 1, 1, 32>}, {transform_indices = @transform_2, window_bounds = array<i64: 1, 1, 32>}, {transform_indices = @transform_3, window_bounds = array<i64: 1, 8, 32, 4>}, {transform_indices = @transform_4, window_bounds = array<i64: 1, 8, 32, 4>}, {transform_indices = @transform_5, window_bounds = array<i64: 1, 8, 32, 4>}, {transform_indices = @transform_6, window_bounds = array<i64: 1, 8, 4, 32>}, {transform_indices = @transform_7, window_bounds = array<i64: 1, 1, 32>}, {transform_indices = @transform_8, window_bounds = array<i64: 1, 1, 32>}, {transform_indices = @transform_9, window_bounds = array<i64: 1, 1, 32>}, {transform_indices = @transform_10, window_bounds = array<i64: 1, 32, 64>}, {transform_indices = @transform_11, window_bounds = array<i64: 1, 1, 64>}, {transform_indices = @transform_12, window_bounds = array<i64: 1, 64, 32>}, {transform_indices = @transform_13, window_bounds = array<i64: 1, 1, 32>}, {transform_indices = @transform_14, window_bounds = array<i64: 1, 8, 32>}]} {
    %c0_i32 = arith.constant 0 : i32
    %0 = arith.cmpi eq, %arg1, %c0_i32 : i32
    %1 = arith.extui %0 : i1 to i32
    %c0_i32_0 = arith.constant 0 : i32
    %2 = arith.cmpi ne, %1, %c0_i32_0 : i32
    scf.if %2 {
      %c0_72 = arith.constant 0 : index
      %c0_73 = arith.constant 0 : index
      %c0_74 = arith.constant 0 : index
      %122 = vector.load %arg2[%c0_72, %c0_73, %c0_74] : memref<1x8x32xf32, #tpu.memory_space<vmem>>, vector<1x8x32xf32>
      %c0_75 = arith.constant 0 : index
      %c0_76 = arith.constant 0 : index
      %c0_77 = arith.constant 0 : index
      %123 = vector.load %arg16[%c0_75, %c0_76, %c0_77] : memref<1x8x32xf32, #tpu.memory_space<vmem>>, vector<1x8x32xf32>
      tpu.vector_store %arg16[%c0_75, %c0_76, %c0_77], %122 {strides = array<i32>} : memref<1x8x32xf32, #tpu.memory_space<vmem>>, vector<1x8x32xf32>,
    } else {
    }
    %c0 = arith.constant 0 : index
    %c0_1 = arith.constant 0 : index
    %c0_2 = arith.constant 0 : index
    %3 = vector.load %arg16[%c0, %c0_1, %c0_2] : memref<1x8x32xf32, #tpu.memory_space<vmem>>, vector<1x8x32xf32>
    %4 = vector.shape_cast %3 : vector<1x8x32xf32> to vector<8x32xf32>
    %c0_3 = arith.constant 0 : index
    %c0_4 = arith.constant 0 : index
    %c0_5 = arith.constant 0 : index
    %5 = vector.load %arg3[%c0_3, %c0_4, %c0_5] : memref<1x1x32xf32, #tpu.memory_space<vmem>>, vector<1x1x32xf32>
    %6 = vector.shape_cast %5 : vector<1x1x32xf32> to vector<1x32xf32>
    %c0_6 = arith.constant 0 : index
    %c0_7 = arith.constant 0 : index
    %c0_8 = arith.constant 0 : index
    %7 = vector.load %arg4[%c0_6, %c0_7, %c0_8] : memref<1x1x32xf32, #tpu.memory_space<vmem>>, vector<1x1x32xf32>
    %8 = vector.shape_cast %7 : vector<1x1x32xf32> to vector<1x32xf32>
    %cst = arith.constant dense<0.000000e+00> : vector<8xf32>
    %9 = vector.multi_reduction <add>, %4, %cst [1] : vector<8x32xf32> to vector<8xf32>
    %10 = vector.shape_cast %9 : vector<8xf32> to vector<8x1xf32>
    %cst_9 = arith.constant 3.200000e+01 : f32
    %11 = vector.broadcast %cst_9 : f32 to vector<8x1xf32>
    %12 = arith.divf %10, %11 : vector<8x1xf32>
    %13 = vector.broadcast %12 : vector<8x1xf32> to vector<8x32xf32>
    %14 = arith.subf %4, %13 : vector<8x32xf32>
    %15 = arith.mulf %14, %14 : vector<8x32xf32>
    %cst_10 = arith.constant dense<0.000000e+00> : vector<8xf32>
    %16 = vector.multi_reduction <add>, %15, %cst_10 [1] : vector<8x32xf32> to vector<8xf32>
    %17 = vector.shape_cast %16 : vector<8xf32> to vector<8x1xf32>
    %cst_11 = arith.constant 3.200000e+01 : f32
    %18 = vector.broadcast %cst_11 : f32 to vector<8x1xf32>
    %19 = arith.divf %17, %18 : vector<8x1xf32>
    %20 = vector.broadcast %12 : vector<8x1xf32> to vector<8x32xf32>
    %21 = arith.subf %4, %20 : vector<8x32xf32>
    %cst_12 = arith.constant 9.99999974E-6 : f32
    %22 = vector.broadcast %cst_12 : f32 to vector<8x1xf32>
    %23 = arith.addf %19, %22 : vector<8x1xf32>
    %24 = math.rsqrt %23 : vector<8x1xf32>
    %25 = vector.broadcast %24 : vector<8x1xf32> to vector<8x32xf32>
    %26 = arith.mulf %21, %25 : vector<8x32xf32>
    %27 = vector.broadcast %6 : vector<1x32xf32> to vector<8x32xf32>
    %28 = arith.mulf %26, %27 : vector<8x32xf32>
    %29 = vector.broadcast %8 : vector<1x32xf32> to vector<8x32xf32>
    %30 = arith.addf %28, %29 : vector<8x32xf32>
    %31 = arith.truncf %30 : vector<8x32xf32> to vector<8x32xbf16>
    %c0_13 = arith.constant 0 : index
    %c0_14 = arith.constant 0 : index
    %c0_15 = arith.constant 0 : index
    %c0_16 = arith.constant 0 : index
    %32 = vector.load %arg5[%c0_13, %c0_14, %c0_15, %c0_16] : memref<1x8x32x4xbf16, #tpu.memory_space<vmem>>, vector<1x8x32x4xbf16>
    %33 = vector.shape_cast %32 : vector<1x8x32x4xbf16> to vector<8x32x4xbf16>
    %c0_17 = arith.constant 0 : index
    %c0_18 = arith.constant 0 : index
    %c0_19 = arith.constant 0 : index
    %c0_20 = arith.constant 0 : index
    %34 = vector.load %arg6[%c0_17, %c0_18, %c0_19, %c0_20] : memref<1x8x32x4xbf16, #tpu.memory_space<vmem>>, vector<1x8x32x4xbf16>
    %35 = vector.shape_cast %34 : vector<1x8x32x4xbf16> to vector<8x32x4xbf16>
    %c0_21 = arith.constant 0 : index
    %c0_22 = arith.constant 0 : index
    %c0_23 = arith.constant 0 : index
    %c0_24 = arith.constant 0 : index
    %36 = vector.load %arg7[%c0_21, %c0_22, %c0_23, %c0_24] : memref<1x8x32x4xbf16, #tpu.memory_space<vmem>>, vector<1x8x32x4xbf16>
    %37 = vector.shape_cast %36 : vector<1x8x32x4xbf16> to vector<8x32x4xbf16>
    %c0_25 = arith.constant 0 : index
    %c0_26 = arith.constant 0 : index
    %c0_27 = arith.constant 0 : index
    %c0_28 = arith.constant 0 : index
    %38 = vector.load %arg8[%c0_25, %c0_26, %c0_27, %c0_28] : memref<1x8x4x32xbf16, #tpu.memory_space<vmem>>, vector<1x8x4x32xbf16>
    %39 = vector.shape_cast %38 : vector<1x8x4x32xbf16> to vector<8x4x32xbf16>
    %40 = vector.shape_cast %31 : vector<8x32xbf16> to vector<1x8x32xbf16>
    %41 = vector.broadcast %40 : vector<1x8x32xbf16> to vector<8x8x32xbf16>
    "tpu.trace_start"() <{level = 10 : i32, message = "hnk,hkd->hnd"}> : () -> ()
    %cst_29 = arith.constant dense<0.000000e+00> : vector<8x8x4xf32>
    %42 = tpu.matmul %41, %33, %cst_29 {dimension_numbers = #tpu.dot_dimension_numbers<[2], [1], [1], [2], [0, 0, 0, 1, 1, 2], [0], [0]>} : vector<8x8x32xbf16>, vector<8x32x4xbf16>, vector<8x8x4xf32> -> vector<8x8x4xf32>
    %cst_30 = arith.constant dense<0.000000e+00> : vector<8x8x4xf32>
    %43 = tpu.matmul %41, %35, %cst_30 {dimension_numbers = #tpu.dot_dimension_numbers<[2], [1], [1], [2], [0, 0, 0, 1, 1, 2], [0], [0]>} : vector<8x8x32xbf16>, vector<8x32x4xbf16>, vector<8x8x4xf32> -> vector<8x8x4xf32>
    %cst_31 = arith.constant dense<0.000000e+00> : vector<8x8x4xf32>
    %44 = tpu.matmul %41, %37, %cst_31 {dimension_numbers = #tpu.dot_dimension_numbers<[2], [1], [1], [2], [0, 0, 0, 1, 1, 2], [0], [0]>} : vector<8x8x32xbf16>, vector<8x32x4xbf16>, vector<8x8x4xf32> -> vector<8x8x4xf32>
    "tpu.trace_stop"() : () -> ()
    %45 = arith.truncf %42 : vector<8x8x4xf32> to vector<8x8x4xbf16>
    %46 = arith.truncf %43 : vector<8x8x4xf32> to vector<8x8x4xbf16>
    "tpu.trace_start"() <{level = 10 : i32, message = "hnd,hmd->hnm"}> : () -> ()
    %cst_32 = arith.constant dense<0.000000e+00> : vector<8x8x8xf32>
    %47 = tpu.matmul %45, %46, %cst_32 {dimension_numbers = #tpu.dot_dimension_numbers<[2], [2], [1], [1], [0, 0, 0, 1, 1, 1], [0], [0]>} : vector<8x8x4xbf16>, vector<8x8x4xbf16>, vector<8x8x8xf32> -> vector<8x8x8xf32>
    "tpu.trace_stop"() : () -> ()
    %cst_33 = arith.constant dense<0xFF800000> : vector<8x8xf32>
    %48 = vector.multi_reduction <maximumf>, %47, %cst_33 [2] : vector<8x8x8xf32> to vector<8x8xf32>
    %49 = vector.shape_cast %48 : vector<8x8xf32> to vector<8x8x1xf32>
    %50 = vector.broadcast %49 : vector<8x8x1xf32> to vector<8x8x8xf32>
    %51 = arith.subf %47, %50 : vector<8x8x8xf32>
    %52 = math.exp %51 : vector<8x8x8xf32>
    %cst_34 = arith.constant dense<0.000000e+00> : vector<8x8xf32>
    %53 = vector.multi_reduction <add>, %52, %cst_34 [2] : vector<8x8x8xf32> to vector<8x8xf32>
    %54 = vector.shape_cast %53 : vector<8x8xf32> to vector<8x8x1xf32>
    %55 = tpu.reciprocal %54 {approx = true} : vector<8x8x1xf32> -> vector<8x8x1xf32>
    %56 = vector.broadcast %55 : vector<8x8x1xf32> to vector<8x8x8xf32>
    %57 = arith.mulf %52, %56 : vector<8x8x8xf32>
    %58 = arith.truncf %57 : vector<8x8x8xf32> to vector<8x8x8xbf16>
    %59 = arith.truncf %44 : vector<8x8x4xf32> to vector<8x8x4xbf16>
    "tpu.trace_start"() <{level = 10 : i32, message = "hnm,hmd->hnd"}> : () -> ()
    %cst_35 = arith.constant dense<0.000000e+00> : vector<8x8x4xf32>
    %60 = tpu.matmul %58, %59, %cst_35 {dimension_numbers = #tpu.dot_dimension_numbers<[2], [1], [1], [2], [0, 0, 0, 1, 1, 2], [0], [0]>} : vector<8x8x8xbf16>, vector<8x8x4xbf16>, vector<8x8x4xf32> -> vector<8x8x4xf32>
    "tpu.trace_stop"() : () -> ()
    %61 = arith.truncf %60 : vector<8x8x4xf32> to vector<8x8x4xbf16>
    "tpu.trace_start"() <{level = 10 : i32, message = "hnd,hdk->hnk"}> : () -> ()
    %cst_36 = arith.constant dense<0.000000e+00> : vector<8x8x32xf32>
    %62 = tpu.matmul %61, %39, %cst_36 {dimension_numbers = #tpu.dot_dimension_numbers<[2], [1], [1], [2], [0, 0, 0, 1, 1, 2], [0], [0]>} : vector<8x8x4xbf16>, vector<8x4x32xbf16>, vector<8x8x32xf32> -> vector<8x8x32xf32>
    "tpu.trace_stop"() : () -> ()
    %cst_37 = arith.constant dense<0.000000e+00> : vector<8x32xf32>
    %63 = vector.multi_reduction <add>, %62, %cst_37 [0] : vector<8x8x32xf32> to vector<8x32xf32>
    %64 = arith.addf %4, %63 : vector<8x32xf32>
    %c0_38 = arith.constant 0 : index
    %c0_39 = arith.constant 0 : index
    %c0_40 = arith.constant 0 : index
    %65 = vector.load %arg9[%c0_38, %c0_39, %c0_40] : memref<1x1x32xf32, #tpu.memory_space<vmem>>, vector<1x1x32xf32>
    %66 = vector.shape_cast %65 : vector<1x1x32xf32> to vector<1x32xf32>
    %67 = vector.broadcast %66 : vector<1x32xf32> to vector<8x32xf32>
    %68 = arith.addf %64, %67 : vector<8x32xf32>
    %c0_41 = arith.constant 0 : index
    %c0_42 = arith.constant 0 : index
    %c0_43 = arith.constant 0 : index
    %69 = vector.load %arg10[%c0_41, %c0_42, %c0_43] : memref<1x1x32xf32, #tpu.memory_space<vmem>>, vector<1x1x32xf32>
    %70 = vector.shape_cast %69 : vector<1x1x32xf32> to vector<1x32xf32>
    %c0_44 = arith.constant 0 : index
    %c0_45 = arith.constant 0 : index
    %c0_46 = arith.constant 0 : index
    %71 = vector.load %arg11[%c0_44, %c0_45, %c0_46] : memref<1x1x32xf32, #tpu.memory_space<vmem>>, vector<1x1x32xf32>
    %72 = vector.shape_cast %71 : vector<1x1x32xf32> to vector<1x32xf32>
    %cst_47 = arith.constant dense<0.000000e+00> : vector<8xf32>
    %73 = vector.multi_reduction <add>, %68, %cst_47 [1] : vector<8x32xf32> to vector<8xf32>
    %74 = vector.shape_cast %73 : vector<8xf32> to vector<8x1xf32>
    %cst_48 = arith.constant 3.200000e+01 : f32
    %75 = vector.broadcast %cst_48 : f32 to vector<8x1xf32>
    %76 = arith.divf %74, %75 : vector<8x1xf32>
    %77 = vector.broadcast %76 : vector<8x1xf32> to vector<8x32xf32>
    %78 = arith.subf %68, %77 : vector<8x32xf32>
    %79 = arith.mulf %78, %78 : vector<8x32xf32>
    %cst_49 = arith.constant dense<0.000000e+00> : vector<8xf32>
    %80 = vector.multi_reduction <add>, %79, %cst_49 [1] : vector<8x32xf32> to vector<8xf32>
    %81 = vector.shape_cast %80 : vector<8xf32> to vector<8x1xf32>
    %cst_50 = arith.constant 3.200000e+01 : f32
    %82 = vector.broadcast %cst_50 : f32 to vector<8x1xf32>
    %83 = arith.divf %81, %82 : vector<8x1xf32>
    %84 = vector.broadcast %76 : vector<8x1xf32> to vector<8x32xf32>
    %85 = arith.subf %68, %84 : vector<8x32xf32>
    %cst_51 = arith.constant 9.99999974E-6 : f32
    %86 = vector.broadcast %cst_51 : f32 to vector<8x1xf32>
    %87 = arith.addf %83, %86 : vector<8x1xf32>
    %88 = math.rsqrt %87 : vector<8x1xf32>
    %89 = vector.broadcast %88 : vector<8x1xf32> to vector<8x32xf32>
    %90 = arith.mulf %85, %89 : vector<8x32xf32>
    %91 = vector.broadcast %70 : vector<1x32xf32> to vector<8x32xf32>
    %92 = arith.mulf %90, %91 : vector<8x32xf32>
    %93 = vector.broadcast %72 : vector<1x32xf32> to vector<8x32xf32>
    %94 = arith.addf %92, %93 : vector<8x32xf32>
    %95 = arith.truncf %94 : vector<8x32xf32> to vector<8x32xbf16>
    %c0_52 = arith.constant 0 : index
    %c0_53 = arith.constant 0 : index
    %c0_54 = arith.constant 0 : index
    %96 = vector.load %arg12[%c0_52, %c0_53, %c0_54] : memref<1x32x64xbf16, #tpu.memory_space<vmem>>, vector<1x32x64xbf16>
    %97 = vector.shape_cast %96 : vector<1x32x64xbf16> to vector<32x64xbf16>
    %cst_55 = arith.constant dense<0.000000e+00> : vector<8x64xf32>
    %98 = tpu.matmul %95, %97, %cst_55 {dimension_numbers = #tpu.dot_dimension_numbers<[1], [0], [0], [1], [0, 0, 1, 1], [], []>} : vector<8x32xbf16>, vector<32x64xbf16>, vector<8x64xf32> -> vector<8x64xf32>
    %c0_56 = arith.constant 0 : index
    %c0_57 = arith.constant 0 : index
    %c0_58 = arith.constant 0 : index
    %99 = vector.load %arg13[%c0_56, %c0_57, %c0_58] : memref<1x1x64xf32, #tpu.memory_space<vmem>>, vector<1x1x64xf32>
    %100 = vector.shape_cast %99 : vector<1x1x64xf32> to vector<1x64xf32>
    %101 = vector.broadcast %100 : vector<1x64xf32> to vector<8x64xf32>
    %102 = arith.addf %98, %101 : vector<8x64xf32>
    %cst_59 = arith.constant 5.000000e-01 : f32
    %103 = vector.broadcast %cst_59 : f32 to vector<8x64xf32>
    %104 = arith.mulf %103, %102 : vector<8x64xf32>
    %cst_60 = arith.constant 0.707106769 : f32
    %105 = vector.broadcast %cst_60 : f32 to vector<8x64xf32>
    %106 = arith.mulf %102, %105 : vector<8x64xf32>
    %107 = math.erf %106 : vector<8x64xf32>
    %cst_61 = arith.constant 1.000000e+00 : f32
    %108 = vector.broadcast %cst_61 : f32 to vector<8x64xf32>
    %109 = arith.addf %108, %107 : vector<8x64xf32>
    %110 = arith.mulf %104, %109 : vector<8x64xf32>
    %111 = arith.truncf %110 : vector<8x64xf32> to vector<8x64xbf16>
    %c0_62 = arith.constant 0 : index
    %c0_63 = arith.constant 0 : index
    %c0_64 = arith.constant 0 : index
    %112 = vector.load %arg14[%c0_62, %c0_63, %c0_64] : memref<1x64x32xbf16, #tpu.memory_space<vmem>>, vector<1x64x32xbf16>
    %113 = vector.shape_cast %112 : vector<1x64x32xbf16> to vector<64x32xbf16>
    %cst_65 = arith.constant dense<0.000000e+00> : vector<8x32xf32>
    %114 = tpu.matmul %111, %113, %cst_65 {dimension_numbers = #tpu.dot_dimension_numbers<[1], [0], [0], [1], [0, 0, 1, 1], [], []>} : vector<8x64xbf16>, vector<64x32xbf16>, vector<8x32xf32> -> vector<8x32xf32>
    %c0_66 = arith.constant 0 : index
    %c0_67 = arith.constant 0 : index
    %c0_68 = arith.constant 0 : index
    %115 = vector.load %arg15[%c0_66, %c0_67, %c0_68] : memref<1x1x32xf32, #tpu.memory_space<vmem>>, vector<1x1x32xf32>
    %116 = vector.shape_cast %115 : vector<1x1x32xf32> to vector<1x32xf32>
    %117 = vector.broadcast %116 : vector<1x32xf32> to vector<8x32xf32>
    %118 = arith.addf %114, %117 : vector<8x32xf32>
    %119 = arith.addf %68, %118 : vector<8x32xf32>
    %120 = vector.shape_cast %119 : vector<8x32xf32> to vector<1x8x32xf32>
    %c0_69 = arith.constant 0 : index
    %c0_70 = arith.constant 0 : index
    %c0_71 = arith.constant 0 : index
    %121 = vector.load %arg16[%c0_69, %c0_70, %c0_71] : memref<1x8x32xf32, #tpu.memory_space<vmem>>, vector<1x8x32xf32>
    tpu.vector_store %arg16[%c0_69, %c0_70, %c0_71], %120 {strides = array<i32>} : memref<1x8x32xf32, #tpu.memory_space<vmem>>, vector<1x8x32xf32>,
    return
  }
  func.func @transform_0(%arg0: i32, %arg1: i32) -> (i32, i32, i32) {
    %c0_i32 = arith.constant 0 : i32
    %c0_i32_0 = arith.constant 0 : i32
    %c0_i32_1 = arith.constant 0 : i32
    return %arg0, %c0_i32, %c0_i32_0 : i32, i32, i32
  }
  func.func @transform_1(%arg0: i32, %arg1: i32) -> (i32, i32, i32) {
    %c0_i32 = arith.constant 0 : i32
    %c0_i32_0 = arith.constant 0 : i32
    %c0_i32_1 = arith.constant 0 : i32
    return %arg1, %c0_i32, %c0_i32_0 : i32, i32, i32
  }
  func.func @transform_2(%arg0: i32, %arg1: i32) -> (i32, i32, i32) {
    %c0_i32 = arith.constant 0 : i32
    %c0_i32_0 = arith.constant 0 : i32
    %c0_i32_1 = arith.constant 0 : i32
    return %arg1, %c0_i32, %c0_i32_0 : i32, i32, i32
  }
  func.func @transform_3(%arg0: i32, %arg1: i32) -> (i32, i32, i32, i32) {
    %c0_i32 = arith.constant 0 : i32
    %c0_i32_0 = arith.constant 0 : i32
    %c0_i32_1 = arith.constant 0 : i32
    %c0_i32_2 = arith.constant 0 : i32
    return %arg1, %c0_i32, %c0_i32_0, %c0_i32_1 : i32, i32, i32, i32
  }
  func.func @transform_4(%arg0: i32, %arg1: i32) -> (i32, i32, i32, i32) {
    %c0_i32 = arith.constant 0 : i32
    %c0_i32_0 = arith.constant 0 : i32
    %c0_i32_1 = arith.constant 0 : i32
    %c0_i32_2 = arith.constant 0 : i32
    return %arg1, %c0_i32, %c0_i32_0, %c0_i32_1 : i32, i32, i32, i32
  }
  func.func @transform_5(%arg0: i32, %arg1: i32) -> (i32, i32, i32, i32) {
    %c0_i32 = arith.constant 0 : i32
    %c0_i32_0 = arith.constant 0 : i32
    %c0_i32_1 = arith.constant 0 : i32
    %c0_i32_2 = arith.constant 0 : i32
    return %arg1, %c0_i32, %c0_i32_0, %c0_i32_1 : i32, i32, i32, i32
  }
  func.func @transform_6(%arg0: i32, %arg1: i32) -> (i32, i32, i32, i32) {
    %c0_i32 = arith.constant 0 : i32
    %c0_i32_0 = arith.constant 0 : i32
    %c0_i32_1 = arith.constant 0 : i32
    %c0_i32_2 = arith.constant 0 : i32
    return %arg1, %c0_i32, %c0_i32_0, %c0_i32_1 : i32, i32, i32, i32
  }
  func.func @transform_7(%arg0: i32, %arg1: i32) -> (i32, i32, i32) {
    %c0_i32 = arith.constant 0 : i32
    %c0_i32_0 = arith.constant 0 : i32
    %c0_i32_1 = arith.constant 0 : i32
    return %arg1, %c0_i32, %c0_i32_0 : i32, i32, i32
  }
  func.func @transform_8(%arg0: i32, %arg1: i32) -> (i32, i32, i32) {
    %c0_i32 = arith.constant 0 : i32
    %c0_i32_0 = arith.constant 0 : i32
    %c0_i32_1 = arith.constant 0 : i32
    return %arg1, %c0_i32, %c0_i32_0 : i32, i32, i32
  }
  func.func @transform_9(%arg0: i32, %arg1: i32) -> (i32, i32, i32) {
    %c0_i32 = arith.constant 0 : i32
    %c0_i32_0 = arith.constant 0 : i32
    %c0_i32_1 = arith.constant 0 : i32
    return %arg1, %c0_i32, %c0_i32_0 : i32, i32, i32
  }
  func.func @transform_10(%arg0: i32, %arg1: i32) -> (i32, i32, i32) {
    %c0_i32 = arith.constant 0 : i32
    %c0_i32_0 = arith.constant 0 : i32
    %c0_i32_1 = arith.constant 0 : i32
    return %arg1, %c0_i32, %c0_i32_0 : i32, i32, i32
  }
  func.func @transform_11(%arg0: i32, %arg1: i32) -> (i32, i32, i32) {
    %c0_i32 = arith.constant 0 : i32
    %c0_i32_0 = arith.constant 0 : i32
    %c0_i32_1 = arith.constant 0 : i32
    return %arg1, %c0_i32, %c0_i32_0 : i32, i32, i32
  }
  func.func @transform_12(%arg0: i32, %arg1: i32) -> (i32, i32, i32) {
    %c0_i32 = arith.constant 0 : i32
    %c0_i32_0 = arith.constant 0 : i32
    %c0_i32_1 = arith.constant 0 : i32
    return %arg1, %c0_i32, %c0_i32_0 : i32, i32, i32
  }
  func.func @transform_13(%arg0: i32, %arg1: i32) -> (i32, i32, i32) {
    %c0_i32 = arith.constant 0 : i32
    %c0_i32_0 = arith.constant 0 : i32
    %c0_i32_1 = arith.constant 0 : i32
    return %arg1, %c0_i32, %c0_i32_0 : i32, i32, i32
  }
  func.func @transform_14(%arg0: i32, %arg1: i32) -> (i32, i32, i32) {
    %c0_i32 = arith.constant 0 : i32
    %c0_i32_0 = arith.constant 0 : i32
    %c0_i32_1 = arith.constant 0 : i32
    return %arg0, %c0_i32, %c0_i32_0 : i32, i32, i32
  }
}

</mosaic_0001>

<bundles_post_ra>
// kernel: transformer_forward.1
= control target key start
LH: loop header
LB: loop body
LE: loop exit
PB: predicated region body
PF: predicated region fallthrough
CT: control target
= control target key end

     0   :  { %s3537_s0 = inlined_call_operand.vmem [shape: f32[2,8,32], index: 0, kind: input, shape index: {}]   ;;  %s3538_s1 = inlined_call_operand.vmem [shape: f32[2,1,32], index: 1, kind: input, shape index: {}]   ;;  %s3539_s2 = inlined_call_operand.vmem [shape: f32[2,1,32], index: 2, kind: input, shape index: {}]   ;;  %s3540_s3 = inlined_call_operand.vmem [shape: bf16[2,8,32,4], index: 3, kind: input, shape index: {}]   ;;  %s3541_s4 = inlined_call_operand.vmem [shape: bf16[2,8,32,4], index: 4, kind: input, shape index: {}]   ;;  %s3542_s5 = inlined_call_operand.vmem [shape: bf16[2,8,32,4], index: 5, kind: input, shape index: {}]   ;;  %s3543_s6 = inlined_call_operand.vmem [shape: bf16[2,8,4,32], index: 6, kind: input, shape index: {}]   ;;  %s3544_s7 = inlined_call_operand.vmem [shape: f32[2,1,32], index: 7, kind: input, shape index: {}]   ;;  %s3545_s8 = inlined_call_operand.vmem [shape: f32[2,1,32], index: 8, kind: input, shape index: {}]   ;;  %s3546_s9 = inlined_call_operand.vmem [shape: f32[2,1,32], index: 9, kind: input, shape index: {}]   ;;  %s3547_s10 = inlined_call_operand.vmem [shape: bf16[2,32,64], index: 10, kind: input, shape index: {}]   ;;  %s3548_s11 = inlined_call_operand.vmem [shape: f32[2,1,64], index: 11, kind: input, shape index: {}]   ;;  %s3549_s12 = inlined_call_operand.vmem [shape: bf16[2,64,32], index: 12, kind: input, shape index: {}]   ;;  %s3550_s13 = inlined_call_operand.vmem [shape: f32[2,1,32], index: 13, kind: input, shape index: {}]   ;;  %s3551_s14 = inlined_call_operand.hbm [shape: f32[2,8,32], index: 14, kind: output, shape index: {}]  }
   0x1   :  { %3568 = sst [smem:[#allocation19_spill]] %s3537_s0 }
   0x2   :  { %3569 = sst [smem:[#allocation20_spill]] %s3540_s3 }
   0x3   :  { %3570 = sst [smem:[#allocation21_spill]] %s3541_s4 }
   0x4   :  { %3571 = sst [smem:[#allocation22_spill]] %s3542_s5 }
   0x5   :  { %3572 = sst [smem:[#allocation23_spill]] %s3543_s6 }
   0x6   :  { %3573 = sst [smem:[#allocation24_spill]] %s3545_s8 }
   0x7   :  { %3574 = sst [smem:[#allocation25_spill]] %s3549_s12 }
   0x8   :  { %3575 = sst [smem:[#allocation26_spill]] %s3551_s14 }
   0x9   :  { %19 = vsyncpa [#allocation3], 0 }
   0xa   :  { %21 = vsyncpa [#allocation3 + $0x1], 0  ;;  %s3091_s29 = smov 0   ;;  %s3093_s30 = smov 0  }
   0xb   :  { %s3095_s15 = smov 0   ;;  %s3097_s16 = smov 0  }
   0xc   :  { %s3099_s17 = smov 0   ;;  %s3101_s18 = smov 0  }
   0xd   :  { %s3103_s19 = smov 0   ;;  %s3105_s20 = smov 0  }
   0xe LB: > { %3576 = sst [smem:[#allocation5_spill]] %s2985_s29  ;;  %s2449_s21 = sadd.s32 4294967295, %s3013_s20   ;;  %s3013_s20 = sphi %s3105_s20, %s27_s20   ;;  %s3009_s19 = sphi %s3103_s19, %s3620_s19   ;;  %s3005_s18 = sphi %s3101_s18, %s3619_s18   ;;  %s3001_s17 = sphi %s3099_s17, %s3618_s17   ;;  %s2997_s16 = sphi %s3097_s16, %s3617_s16   ;;  %s2993_s15 = sphi %s3095_s15, %s3616_s15   ;;  %s2989_s30 = sphi %s3093_s30, %s3615_s30   ;;  %s2985_s29 = sphi %s3091_s29, %s3614_s29  }
   0xf   : > { %3577 = sst [smem:[#allocation6_spill]] %s2989_s30  ;;  %s2450_s22 = sadd.s32 4294967294, %s3013_s20  }
  0x10   : > { %3578 = sst [smem:[#allocation7_spill]] %s2993_s15  ;;  %s36_s23 = sadd.s32 1, %s3005_s18 }
  0x11   : > { %3579 = sst [smem:[#allocation8_spill]] %s2997_s16  ;;  %p37_p0 = scmp.ge.s32.totalorder %s36_s23, 2 }
  0x12   : > { %3580 = sst [smem:[#allocation9_spill]] %s3001_s17  ;;  %s39_s24 = sadd.s32 1, %s3009_s19 }
  0x13   : > { %3581 = sst [smem:[#allocation10_spill]] %s3005_s18  ;;  %p420_p1 = scmp.ne.s32.totalorder %s2993_s15, %s2989_s30 }
  0x14   : > { %3582 = sst [smem:[#allocation11_spill]] %s3009_s19  ;;  %p421_p2 = scmp.eq.s32.totalorder %s2449_s21, 3 }
  0x15   : > { %3583 = sst [smem:[#allocation12_spill]] %s3013_s20  ;;  %s3622_s23 = smov (%p37_p0, %s36_s23), 0 }
  0x16   : > { %3584 = sst [smem:[#allocation13_spill]] %s3622_s23  ;;  %s3624_s24 = smov (!%p37_p0, %s39_s24), %s3009_s19 }
  0x17   : > { %p3140_p3 = por %p421_p2, %p420_p1  ;;  %p426_p4 = scmp.ne.s32.totalorder %s2989_s30, %s2985_s29 }
  0x18   : > { %p41_p5 = scmp.ge.s32.totalorder %s3624_s24, 2  ;;  %p427_p6 = scmp.eq.s32.totalorder %s2450_s22, 3 }
  0x19   : > { %s3585_s25 = scalar_select %p3140_p3, 1, 0 }
  0x1a   : > { %p2453_p7 = scmp.ge.s32.totalorder %s3013_s20, 1  ;;  %p542_p8 = scmp.lt.s32.totalorder %s3013_s20, 5 }
  0x1b   : > { %3586 = sst [smem:[#allocation14_spill]] %s3585_s25  ;;  %s3626_s24 = smov (%p41_p5, %s3624_s24), 0 }
  0x1c   : > { %3587 = sst [smem:[#allocation15_spill]] %s3626_s24  ;;  %p3150_p9 = por %p427_p6, %p426_p4 }
  0x1d   : > { %p543_p10 = pnand %p2453_p7, %p542_p8  ;;  %s407_s27 = ssub.s32 %s3009_s19, %s3626_s24 }
  0x1e   : > { %s3588_s26 = scalar_select %p3150_p9, 1, 0 }
  0x1f   : > { %s410_s28 = sadd.s32 1, %s2993_s15  ;;  %p408_p11 = scmp.eq.s32.totalorder %s407_s27, 0 }
  0x20   : > { %3589 = sst [smem:[#allocation16_spill]] %s3588_s26  ;;  %546 = sbr.rel (%p543_p10) target bundleno = 1786 (0x6fa), region = 76 }
  0x21   : > { %s3158_s21 = scalar_select %p408_p11, %s2993_s15, %s410_s28  }
  0x23   : > { %3590 = sst [smem:[#allocation17_spill]] %s3158_s21 }
  0x25   : > { %s3556_s22 = sand.u32 1, %s2989_s30   ;;  %p638_p12 = scmp.lt.s32.totalorder %s3001_s17, 1 }
  0x26   : > { %s2454_s23 = sshll.u32 %s3556_s22, 3  ;;  %p642_p13 = scmp.lt.s32.totalorder %s2997_s16, 1 }
  0x27   : > { %s639_s18 = scalar_select %p638_p12, %s3001_s17, 1 }
  0x28   : > { %s3167_s26 = scalar_select %p642_p13, %s2997_s16, 1 }
  0x29   : > { %s2455_s27 = sshll.u32 %s639_s18, 3  ;;  %s3591_s0 = sld [smem:[#allocation19_spill]] }
  0x2a   : > { %s2740_s25 = sshll.u32 %s3167_s26, 7  ;;  %s3592_s3 = sld [smem:[#allocation20_spill]] }
  0x2b   : > { %s3593_s4 = sld [smem:[#allocation21_spill]]  ;;  %s2743_s22 = sshll.u32 %s3167_s26, 4 }
  0x2c   : > { %s3594_s5 = sld [smem:[#allocation22_spill]]  ;;  %s692_s17 = scalar_lea.vmem %s3550_s13, %s3167_s26 }
  0x2d   : > { %s3595_s6 = sld [smem:[#allocation23_spill]] }
  0x2e   : > { %s3598_s12 = sld [smem:[#allocation25_spill]] }
  0x2f   : > { %s641_s19 = scalar_lea.vmem %s3591_s0, %s2455_s27  ;;  %s676_s27 = scalar_lea.vmem %s3546_s9, %s3167_s26 }
  0x30   : > { %s3184_s16 = scalar_lea.vmem %s3592_s3, %s2740_s25  ;;  %s3599_s18 = sld [smem:[#allocation8_spill]] }
  0x31   : > { %s3189_s24 = scalar_lea.vmem %s3593_s4, %s2740_s25  ;;  %s3233_s4 = scalar_lea.vmem [#allocation2], %s2454_s23 }
  0x32   : > { %s3194_s21 = scalar_lea.vmem %s3594_s5, %s2740_s25  ;;  %s3217_s5 = scalar_lea.vmem %s3547_s10, %s2743_s22 }
  0x33   : > { %s3200_s20 = scalar_lea.vmem %s3595_s6, %s2743_s22  ;;  %s684_s6 = scalar_lea.vmem %s3548_s11, %s3167_s26 }
  0x34   : > { %3596 = sst [smem:[#allocation18_spill]] %s3200_s20  ;;  %s2745_s20 = sshll.u32 %s3167_s26, 5 }
  0x35   : > { %s3231_s8 = scalar_lea.vmem %s3598_s12, %s2745_s20 }
  0x36   : > { %p2468_p0 = scmp.ne.s32.totalorder %s3599_s18, 0 }
  0x38   : > { %697 = sbr.rel (%p2468_p0) target bundleno = 63 (0x3f), region = 80 }
  0x3d   : > { %v698_v0 = vld [vmem:[%s641_s19] sm:$0xff]  ;;  %vm699_vm0 = vcmask 261120  }
  0x3e   : > { %700 = vst.msk [vmem:[%s3233_s4] sm:$0xff] %vm699_vm0, %v698_v0 }
  0x3f PF: > { %vm704_vm1 = vcmask 261120   ;;  %v3015_v3 = vmov 32.0   ;;  %v2747_v15 = vld [vmem:[%s3184_s16 + $0x8] sm:$0xff]  ;;  %v2749_v16 = vld [vmem:[%s3184_s16 + $0x18] sm:$0xff]  ;;  %v2746_v19 = vld [vmem:[%s3184_s16] sm:$0xff]  ;;  %s3600_s23 = scalar_lea.vmem %s3538_s1, %s3167_s26  ;;  %s3601_s12 = scalar_lea.vmem %s3539_s2, %s3167_s26  ;;  %vm1466_vm6 = vcmask 31744  }
  0x40   : > { %2879 = vrcp.f32 %v3015_v3  ;;  %v2751_v17 = vld [vmem:[%s3184_s16 + $0x28] sm:$0xff]  ;;  %v2753_v18 = vld [vmem:[%s3184_s16 + $0x38] sm:$0xff]  ;;  %868 = vmatpush.bf16.msra.mxu0 %v2747_v15  ;;  %893 = vmatpush.bf16.msra.mxu1 %v2749_v16  ;;  %v2748_v20 = vld [vmem:[%s3184_s16 + $0x10] sm:$0xff]  ;;  %vm1727_vm7 = vcmask 1043456   ;;  %vm1619_vm8 = vcmask 64512   ;;  %vm1888_vm9 = vcmask 1041408   ;;  %s3603_s28 = scalar_lea.vmem %s3544_s7, %s3167_s26 }
  0x41   : > { %918 = vmatpush.bf16.msra.mxu2 %v2751_v17  ;;  %943 = vmatpush.bf16.msra.mxu3 %v2753_v18  ;;  %v2750_v21 = vld [vmem:[%s3184_s16 + $0x20] sm:$0xff]  ;;  %v2752_v22 = vld [vmem:[%s3184_s16 + $0x30] sm:$0xff]  ;;  %v2755_v24 = vld [vmem:[%s3184_s16 + $0x48] sm:$0xff]  ;;  %s3604_s14 = sld [smem:[#allocation24_spill]] }
  0x42   : > { %v2757_v25 = vld [vmem:[%s3184_s16 + $0x58] sm:$0xff]  ;;  %v2759_v26 = vld [vmem:[%s3184_s16 + $0x68] sm:$0xff]  ;;  %v2754_v29 = vld [vmem:[%s3184_s16 + $0x40] sm:$0xff] }
  0x43   : > { %v2761_v28 = vld [vmem:[%s3184_s16 + $0x78] sm:$0xff]  ;;  %v2756_v30 = vld [vmem:[%s3184_s16 + $0x50] sm:$0xff]  ;;  %v2758_v32 = vld [vmem:[%s3184_s16 + $0x60] sm:$0xff] }
  0x44   : > { %869 = vmatpush.bf16.msra.mxu0 %v2746_v19  ;;  %894 = vmatpush.bf16.msra.mxu1 %v2748_v20  ;;  %v2760_v33 = vld [vmem:[%s3184_s16 + $0x70] sm:$0xff]  ;;  %v2872_v40 = vld [vmem:[%s3600_s23] ss:$0 sm:$0xff]  ;;  %v2763_v47 = vld [vmem:[%s3189_s24 + $0x8] sm:$0xff] }
  0x45   : > { %v3238_v1 = vld [vmem:[%s3233_s4] sm:$0xff]  ;;  %919 = vmatpush.bf16.msra.mxu2 %v2750_v21  ;;  %944 = vmatpush.bf16.msra.mxu3 %v2752_v22  ;;  %v2765_v48 = vld [vmem:[%s3189_s24 + $0x18] sm:$0xff]  ;;  %v2764_v52 = vld [vmem:[%s3189_s24 + $0x10] sm:$0xff] }
  0x46   : > { %v705_v2 = vsel %vm704_vm1, %v3238_v1, 0.0  ;;  %v2880_v4 = vpop.eup %2879  ;;  %v2873_v42 = vld [vmem:[%s3601_s12] ss:$0 sm:$0xff]  ;;  %v2767_v49 = vld [vmem:[%s3189_s24 + $0x28] sm:$0xff]  ;;  %v2769_v50 = vld [vmem:[%s3189_s24 + $0x38] sm:$0xff]  ;;  %s3609_s12 = sld [smem:[#allocation26_spill]] }
  0x47   : > { %706 = vadd.xlane.f32.xlu0 %v705_v2  ;;  %v709_v5 = vmul.f32 32.0, %v2880_v4  ;;  %vm713_vm2 = vweird.f32 %v2880_v4  ;;  %v2762_v51 = vld [vmem:[%s3189_s24] sm:$0xff]  ;;  %v2768_v54 = vld [vmem:[%s3189_s24 + $0x30] sm:$0xff]  ;;  %v2771_v55 = vld [vmem:[%s3189_s24 + $0x48] sm:$0xff] }
  0x48   : > { %968 = vmatpush.bf16.msrb.mxu0 %v2755_v24  ;;  %993 = vmatpush.bf16.msrb.mxu1 %v2757_v25  ;;  %v2766_v53 = vld [vmem:[%s3189_s24 + $0x20] sm:$0xff]  ;;  %v2773_v56 = vld [vmem:[%s3189_s24 + $0x58] sm:$0xff]  ;;  %v2775_v57 = vld [vmem:[%s3189_s24 + $0x68] sm:$0xff] }
  0x49   : > { %v710_v6 = vsub.f32 1.0, %v709_v5  ;;  %1018 = vmatpush.bf16.msrb.mxu2 %v2759_v26  ;;  %1043 = vmatpush.bf16.msrb.mxu3 %v2761_v28  ;;  %v2777_v58 = vld [vmem:[%s3189_s24 + $0x78] sm:$0xff]  ;;  %v2770_v59 = vld [vmem:[%s3189_s24 + $0x40] sm:$0xff]  ;;  %v2772_v60 = vld [vmem:[%s3189_s24 + $0x50] sm:$0xff] }
  0x4a   : > { %v2774_v61 = vld [vmem:[%s3189_s24 + $0x60] sm:$0xff]  ;;  %v2776_v62 = vld [vmem:[%s3189_s24 + $0x70] sm:$0xff]  ;;  %v2779_v63 = vld [vmem:[%s3194_s21 + $0x8] sm:$0xff]  ;;  %s3602_s24 = sld [smem:[#allocation18_spill]] }
  0x4b   : > { %v711_v7 = vmul.f32 %v2880_v4, %v710_v6  ;;  %v2781_v0 = vld [vmem:[%s3194_s21 + $0x18] sm:$0xff]  ;;  %v2783_v2 = vld [vmem:[%s3194_s21 + $0x28] sm:$0xff]  ;;  %v2780_v5 = vld [vmem:[%s3194_s21 + $0x10] sm:$0xff] }
  0x4c   : > { %969 = vmatpush.bf16.msrb.mxu0 %v2754_v29  ;;  %994 = vmatpush.bf16.msrb.mxu1 %v2756_v30  ;;  %v2785_v3 = vld [vmem:[%s3194_s21 + $0x38] sm:$0xff]  ;;  %v2782_v6 = vld [vmem:[%s3194_s21 + $0x20] sm:$0xff]  ;;  %v2792_v16 = vld [vmem:[%s3194_s21 + $0x70] sm:$0xff] }
  0x4d   : > { %v712_v8 = vadd.f32 %v2880_v4, %v711_v7  ;;  %1019 = vmatpush.bf16.msrb.mxu2 %v2758_v32  ;;  %1044 = vmatpush.bf16.msrb.mxu3 %v2760_v33  ;;  %v2784_v7 = vld [vmem:[%s3194_s21 + $0x30] sm:$0xff]  ;;  %v2790_v15 = vld [vmem:[%s3194_s21 + $0x60] sm:$0xff] }
  0x4f   : > { %v3242_v9 = vsel %vm713_vm2, %v2880_v4, %v712_v8  ;;  %v2778_v4 = vld [vmem:[%s3194_s21] sm:$0xff]  ;;  %v2787_v8 = vld [vmem:[%s3194_s21 + $0x48] sm:$0xff]  ;;  %vm2209_vm2 = vcmask 523264  }
  0xba   : > { %v707_v10 = vpop.xlane.xlu0 %706 }
  0xbb   : > { %v715_v11 = vmul.f32 %v3242_v9, %v707_v10  ;;  %v2789_v10 = vld [vmem:[%s3194_s21 + $0x58] sm:$0xff] }
  0xbd   : > { %v716_v12 = vsub.f32 %v3238_v1, %v715_v11  ;;  %v2791_v11 = vld [vmem:[%s3194_s21 + $0x68] sm:$0xff] }
  0xbf   : > { %v717_v13 = vmul.f32 %v716_v12, %v716_v12 }
  0xc1   : > { %v718_v14 = vsel %vm704_vm1, %v717_v13, 0.0  ;;  %v2786_v13 = vld [vmem:[%s3194_s21 + $0x40] sm:$0xff] }
  0xc2   : > { %719 = vadd.xlane.f32.xlu0 %v718_v14  ;;  %v2788_v14 = vld [vmem:[%s3194_s21 + $0x50] sm:$0xff] }
 0x135   : > { %v720_v23 = vpop.xlane.xlu0 %719 }
 0x136   : > { %v721_v27 = vmul.f32 %v720_v23, %v3242_v9 }
 0x138   : > { %v722_v31 = vadd.f32 1e-05, %v721_v27 }
 0x13a   : > { %2881 = vrsqrt.f32 %v722_v31  ;;  %vm729_vm4 = vweird.f32 %v722_v31 }
 0x140   : > { %v2882_v34 = vpop.eup %2881 }
 0x141   : > { %v724_v35 = vmul.f32 %v2882_v34, %v722_v31  ;;  %vm730_vm3 = vweird.f32 %v2882_v34 }
 0x142   : > { %vm731_vm5 = vmor %vm729_vm4, %vm730_vm3 }
 0x143   : > { %v725_v36 = vmul.f32 %v2882_v34, %v724_v35 }
 0x145   : > { %v726_v37 = vmul.f32 0.5, %v725_v36 }
 0x147   : > { %v727_v38 = vsub.f32 1.5, %v726_v37 }
 0x149   : > { %v728_v39 = vmul.f32 %v2882_v34, %v727_v38 }
 0x14b   : > { %v732_v41 = vsel %vm731_vm5, %v2882_v34, %v728_v39 }
 0x14c   : > { %v733_v43 = vmul.f32 %v732_v41, %v716_v12  ;;  %v2793_v12 = vld [vmem:[%s3194_s21 + $0x78] sm:$0xff]  ;;  %s2241_s21 = sshll.u32 %s3233_s4, 4  ;;  %s2242_s21 = int_to_ptr.vmem [resolvable:$true] %s2241_s21 }
 0x14e   : > { %v737_v44 = vmul.f32 %v2872_v40, %v733_v43 }
 0x150   : > { %v741_v45 = vadd.f32 %v2873_v42, %v737_v44 }
 0x152   : > { %v3274_v46 = vpack.c.bf16 %v741_v45, %v741_v45 }
 0x154   : > { %2477 = vmatmul.msk.bf16.vlgmr.msra.gmra.mxu0 %vm704_vm1, %v3274_v46  ;;  %2486 = vmatmul.msk.bf16.vlgmr.msra.gmra.mxu1 %vm704_vm1, %v3274_v46 }
 0x155   : > { %2495 = vmatmul.msk.bf16.vlgmr.msra.gmra.mxu2 %vm704_vm1, %v3274_v46  ;;  %2504 = vmatmul.msk.bf16.vlgmr.msra.gmra.mxu3 %vm704_vm1, %v3274_v46 }
 0x156   : > { %1068 = vmatpush.bf16.msra.mxu0 %v2763_v47  ;;  %1093 = vmatpush.bf16.msra.mxu1 %v2765_v48 }
 0x157   : > { %1118 = vmatpush.bf16.msra.mxu2 %v2767_v49  ;;  %1143 = vmatpush.bf16.msra.mxu3 %v2769_v50 }
 0x15a   : > { %1069 = vmatpush.bf16.msra.mxu0 %v2762_v51  ;;  %1094 = vmatpush.bf16.msra.mxu1 %v2764_v52 }
 0x15b   : > { %1119 = vmatpush.bf16.msra.mxu2 %v2766_v53  ;;  %1144 = vmatpush.bf16.msra.mxu3 %v2768_v54 }
 0x164   : > { %2513 = vmatmul.msk.bf16.vlgmr.msrb.gmra.mxu0 %vm704_vm1, %v3274_v46  ;;  %2522 = vmatmul.msk.bf16.vlgmr.msrb.gmra.mxu1 %vm704_vm1, %v3274_v46 }
 0x165   : > { %2531 = vmatmul.msk.bf16.vlgmr.msrb.gmra.mxu2 %vm704_vm1, %v3274_v46  ;;  %2540 = vmatmul.msk.bf16.vlgmr.msrb.gmra.mxu3 %vm704_vm1, %v3274_v46 }
 0x166   : > { %1168 = vmatpush.bf16.msrb.mxu0 %v2771_v55  ;;  %1193 = vmatpush.bf16.msrb.mxu1 %v2773_v56 }
 0x167   : > { %1218 = vmatpush.bf16.msrb.mxu2 %v2775_v57  ;;  %1243 = vmatpush.bf16.msrb.mxu3 %v2777_v58 }
 0x16a   : > { %1169 = vmatpush.bf16.msrb.mxu0 %v2770_v59  ;;  %1194 = vmatpush.bf16.msrb.mxu1 %v2772_v60 }
 0x16b   : > { %1219 = vmatpush.bf16.msrb.mxu2 %v2774_v61  ;;  %1244 = vmatpush.bf16.msrb.mxu3 %v2776_v62 }
 0x174   : > { %2549 = vmatmul.msk.bf16.vlgmr.msra.gmra.mxu0 %vm704_vm1, %v3274_v46  ;;  %2558 = vmatmul.msk.bf16.vlgmr.msra.gmra.mxu1 %vm704_vm1, %v3274_v46 }
 0x175   : > { %2567 = vmatmul.msk.bf16.vlgmr.msra.gmra.mxu2 %vm704_vm1, %v3274_v46  ;;  %2576 = vmatmul.msk.bf16.vlgmr.msra.gmra.mxu3 %vm704_vm1, %v3274_v46 }
 0x176   : > { %1268 = vmatpush.bf16.msra.mxu0 %v2779_v63  ;;  %1293 = vmatpush.bf16.msra.mxu1 %v2781_v0 }
 0x177   : > { %1318 = vmatpush.bf16.msra.mxu2 %v2783_v2  ;;  %1343 = vmatpush.bf16.msra.mxu3 %v2785_v3 }
 0x17a   : > { %1269 = vmatpush.bf16.msra.mxu0 %v2778_v4  ;;  %1294 = vmatpush.bf16.msra.mxu1 %v2780_v5 }
 0x17b   : > { %1319 = vmatpush.bf16.msra.mxu2 %v2782_v6  ;;  %1344 = vmatpush.bf16.msra.mxu3 %v2784_v7 }
 0x184   : > { %2585 = vmatmul.msk.bf16.vlgmr.msrb.gmra.mxu0 %vm704_vm1, %v3274_v46  ;;  %2594 = vmatmul.msk.bf16.vlgmr.msrb.gmra.mxu1 %vm704_vm1, %v3274_v46 }
 0x185   : > { %2603 = vmatmul.msk.bf16.vlgmr.msrb.gmra.mxu2 %vm704_vm1, %v3274_v46  ;;  %2612 = vmatmul.msk.bf16.vlgmr.msrb.gmra.mxu3 %vm704_vm1, %v3274_v46 }
 0x186   : > { %1368 = vmatpush.bf16.msrb.mxu0 %v2787_v8  ;;  %1393 = vmatpush.bf16.msrb.mxu1 %v2789_v10 }
 0x187   : > { %1418 = vmatpush.bf16.msrb.mxu2 %v2791_v11  ;;  %1443 = vmatpush.bf16.msrb.mxu3 %v2793_v12 }
 0x18a   : > { %1369 = vmatpush.bf16.msrb.mxu0 %v2786_v13  ;;  %1394 = vmatpush.bf16.msrb.mxu1 %v2788_v14 }
 0x18b   : > { %1419 = vmatpush.bf16.msrb.mxu2 %v2790_v15  ;;  %1444 = vmatpush.bf16.msrb.mxu3 %v2792_v16 }
 0x194   : > { %2621 = vmatmul.msk.bf16.vlgmr.msra.gmra.mxu0 %vm704_vm1, %v3274_v46  ;;  %2630 = vmatmul.msk.bf16.vlgmr.msra.gmra.mxu1 %vm704_vm1, %v3274_v46 }
 0x195   : > { %2639 = vmatmul.msk.bf16.vlgmr.msra.gmra.mxu2 %vm704_vm1, %v3274_v46  ;;  %2648 = vmatmul.msk.bf16.vlgmr.msra.gmra.mxu3 %vm704_vm1, %v3274_v46 }
 0x1a4   : > { %2657 = vmatmul.msk.bf16.vlgmr.msrb.gmra.mxu0 %vm704_vm1, %v3274_v46  ;;  %2666 = vmatmul.msk.bf16.vlgmr.msrb.gmra.mxu1 %vm704_vm1, %v3274_v46 }
 0x1a5   : > { %2675 = vmatmul.msk.bf16.vlgmr.msrb.gmra.mxu2 %vm704_vm1, %v3274_v46  ;;  %2684 = vmatmul.msk.bf16.vlgmr.msrb.gmra.mxu3 %vm704_vm1, %v3274_v46 }
 0x1d1   : > { %v871_v17 = vpop.f32.mrf.mxu0  ;;  %v896_v18 = vpop.f32.mrf.mxu1 }
 0x1d2   : > { %v1450_v45 = vpack.c.bf16 %v871_v17, %v871_v17  ;;  %v1451_v46 = vpack.c.bf16 %v896_v18, %v896_v18 }
 0x1d8   : > { %v921_v19 = vpop.f32.mrf.mxu2  ;;  %v946_v20 = vpop.f32.mrf.mxu3 }
 0x1d9   : > { %v873_v21 = vpop.f32.mrf.mxu0  ;;  %v898_v22 = vpop.f32.mrf.mxu1  ;;  %v1452_v51 = vpack.c.bf16 %v921_v19, %v921_v19  ;;  %v1453_v52 = vpack.c.bf16 %v946_v20, %v946_v20 }
 0x1e0   : > { %v923_v23 = vpop.f32.mrf.mxu2  ;;  %v948_v24 = vpop.f32.mrf.mxu3 }
 0x1e1   : > { %v971_v25 = vpop.f32.mrf.mxu0  ;;  %v996_v26 = vpop.f32.mrf.mxu1 }
 0x1e2   : > { %v1454_v2 = vpack.c.bf16 %v971_v25, %v971_v25  ;;  %v1455_v3 = vpack.c.bf16 %v996_v26, %v996_v26 }
 0x1e8   : > { %v3356_v27 = vpop.f32.mrf.mxu2  ;;  %v3358_v28 = vpop.f32.mrf.mxu3 }
 0x1e9   : > { %v973_v29 = vpop.f32.mrf.mxu0  ;;  %v998_v30 = vpop.f32.mrf.mxu1  ;;  %v1456_v8 = vpack.c.bf16 %v3356_v27, %v3356_v27  ;;  %v1457_v10 = vpack.c.bf16 %v3358_v28, %v3358_v28 }
 0x1f0   : > { %v1023_v31 = vpop.f32.mrf.mxu2  ;;  %v1048_v32 = vpop.f32.mrf.mxu3 }
 0x1f1   : > { %v1071_v33 = vpop.f32.mrf.mxu0  ;;  %v1096_v34 = vpop.f32.mrf.mxu1 }
 0x1f2   : > { %v1458_v35 = vpack.c.bf16 %v1071_v33, %v1071_v33  ;;  %v1459_v36 = vpack.c.bf16 %v1096_v34, %v1096_v34 }
 0x1f4   : > { %v1471_v37 = vsel %vm1466_vm6, %v1458_v35, 0  ;;  %v1490_v38 = vsel %vm1466_vm6, %v1459_v36, 0 }
 0x1f5   : > { %1480 = vmatpush.bf16.xpose.msra.mxu0 %v1471_v37  ;;  %1499 = vmatpush.bf16.xpose.msra.mxu1 %v1490_v38 }
 0x1f8   : > { %v1121_v39 = vpop.f32.mrf.mxu2  ;;  %v1146_v40 = vpop.f32.mrf.mxu3 }
 0x1f9   : > { %v1460_v41 = vpack.c.bf16 %v1121_v39, %v1121_v39  ;;  %v1461_v42 = vpack.c.bf16 %v1146_v40, %v1146_v40  ;;  %v1073_v43 = vpop.f32.mrf.mxu0  ;;  %v1098_v44 = vpop.f32.mrf.mxu1 }
 0x1fb   : > { %v1509_v47 = vsel %vm1466_vm6, %v1460_v41, 0  ;;  %v1528_v48 = vsel %vm1466_vm6, %v1461_v42, 0 }
 0x1fc   : > { %1518 = vmatpush.bf16.xpose.msra.mxu2 %v1509_v47  ;;  %1537 = vmatpush.bf16.xpose.msra.mxu3 %v1528_v48 }
 0x1fd   : > { %2685 = vmatmul.msk.bf16.vlgmr.msra.gmra.mxu0 %vm1466_vm6, %v1450_v45  ;;  %2686 = vmatmul.msk.bf16.vlgmr.msra.gmra.mxu1 %vm1466_vm6, %v1451_v46 }
 0x200   : > { %v1123_v49 = vpop.f32.mrf.mxu2  ;;  %v1148_v50 = vpop.f32.mrf.mxu3 }
 0x201   : > { %v1171_v53 = vpop.f32.mrf.mxu0  ;;  %v1196_v54 = vpop.f32.mrf.mxu1 }
 0x202   : > { %v1462_v55 = vpack.c.bf16 %v1171_v53, %v1171_v53  ;;  %v1463_v56 = vpack.c.bf16 %v1196_v54, %v1196_v54 }
 0x203   : > { %2687 = vmatmul.msk.bf16.vlgmr.msra.gmra.mxu2 %vm1466_vm6, %v1452_v51  ;;  %2688 = vmatmul.msk.bf16.vlgmr.msra.gmra.mxu3 %vm1466_vm6, %v1453_v52 }
 0x204   : > { %v1547_v57 = vsel %vm1466_vm6, %v1462_v55, 0  ;;  %v1566_v58 = vsel %vm1466_vm6, %v1463_v56, 0 }
 0x205   : > { %1556 = vmatpush.bf16.xpose.msrb.mxu0 %v1547_v57  ;;  %1575 = vmatpush.bf16.xpose.msrb.mxu1 %v1566_v58 }
 0x208   : > { %v1221_v59 = vpop.f32.mrf.mxu2  ;;  %v1246_v60 = vpop.f32.mrf.mxu3 }
 0x209   : > { %v1464_v61 = vpack.c.bf16 %v1221_v59, %v1221_v59  ;;  %v1465_v62 = vpack.c.bf16 %v1246_v60, %v1246_v60  ;;  %v1173_v63 = vpop.f32.mrf.mxu0  ;;  %v1198_v0 = vpop.f32.mrf.mxu1 }
 0x20b   : > { %v1585_v4 = vsel %vm1466_vm6, %v1464_v61, 0  ;;  %v1604_v5 = vsel %vm1466_vm6, %v1465_v62, 0 }
 0x20c   : > { %1594 = vmatpush.bf16.xpose.msrb.mxu2 %v1585_v4  ;;  %1613 = vmatpush.bf16.xpose.msrb.mxu3 %v1604_v5 }
 0x20d   : > { %2689 = vmatmul.msk.bf16.vlgmr.msrb.gmra.mxu0 %vm1466_vm6, %v1454_v2  ;;  %2690 = vmatmul.msk.bf16.vlgmr.msrb.gmra.mxu1 %vm1466_vm6, %v1455_v3 }
 0x210   : > { %v1223_v6 = vpop.f32.mrf.mxu2  ;;  %v1248_v7 = vpop.f32.mrf.mxu3 }
 0x211   : > { %v1271_v11 = vpop.f32.mrf.mxu0  ;;  %v1296_v12 = vpop.f32.mrf.mxu1 }
 0x212   : > { %v1716_v13 = vpack.c.bf16 %v1271_v11, %v1271_v11  ;;  %v1717_v14 = vpack.c.bf16 %v1296_v12, %v1296_v12 }
 0x213   : > { %2691 = vmatmul.msk.bf16.vlgmr.msrb.gmra.mxu2 %vm1466_vm6, %v1456_v8  ;;  %2692 = vmatmul.msk.bf16.vlgmr.msrb.gmra.mxu3 %vm1466_vm6, %v1457_v10 }
 0x214   : > { %v1729_v15 = vsel %vm1727_vm7, %v1716_v13, 0  ;;  %v1748_v16 = vsel %vm1727_vm7, %v1717_v14, 0 }
 0x215   : > { %1738 = vmatpush.bf16.msra.mxu0 %v1729_v15  ;;  %1757 = vmatpush.bf16.msra.mxu1 %v1748_v16 }
 0x218   : > { %v1321_v17 = vpop.f32.mrf.mxu2  ;;  %v1346_v18 = vpop.f32.mrf.mxu3 }
 0x219   : > { %v1718_v19 = vpack.c.bf16 %v1321_v17, %v1321_v17  ;;  %v1719_v20 = vpack.c.bf16 %v1346_v18, %v1346_v18  ;;  %v1273_v21 = vpop.f32.mrf.mxu0  ;;  %v1298_v22 = vpop.f32.mrf.mxu1 }
 0x21b   : > { %v1767_v23 = vsel %vm1727_vm7, %v1718_v19, 0  ;;  %v1786_v24 = vsel %vm1727_vm7, %v1719_v20, 0 }
 0x21c   : > { %1776 = vmatpush.bf16.msra.mxu2 %v1767_v23  ;;  %1795 = vmatpush.bf16.msra.mxu3 %v1786_v24 }
 0x220   : > { %v1323_v25 = vpop.f32.mrf.mxu2  ;;  %v1348_v26 = vpop.f32.mrf.mxu3 }
 0x221   : > { %v1371_v27 = vpop.f32.mrf.mxu0  ;;  %v1396_v28 = vpop.f32.mrf.mxu1 }
 0x222   : > { %v1720_v29 = vpack.c.bf16 %v1371_v27, %v1371_v27  ;;  %v1721_v30 = vpack.c.bf16 %v1396_v28, %v1396_v28 }
 0x224   : > { %v1805_v31 = vsel %vm1727_vm7, %v1720_v29, 0  ;;  %v1824_v32 = vsel %vm1727_vm7, %v1721_v30, 0 }
 0x225   : > { %1814 = vmatpush.bf16.msrb.mxu0 %v1805_v31  ;;  %1833 = vmatpush.bf16.msrb.mxu1 %v1824_v32 }
 0x228   : > { %v1421_v33 = vpop.f32.mrf.mxu2  ;;  %v1446_v34 = vpop.f32.mrf.mxu3 }
 0x229   : > { %v1722_v35 = vpack.c.bf16 %v1421_v33, %v1421_v33  ;;  %v1723_v36 = vpack.c.bf16 %v1446_v34, %v1446_v34  ;;  %v1373_v37 = vpop.f32.mrf.mxu0  ;;  %v1398_v38 = vpop.f32.mrf.mxu1 }
 0x22b   : > { %v1843_v39 = vsel %vm1727_vm7, %v1722_v35, 0  ;;  %v1862_v40 = vsel %vm1727_vm7, %v1723_v36, 0 }
 0x22c   : > { %1852 = vmatpush.bf16.msrb.mxu2 %v1843_v39  ;;  %1871 = vmatpush.bf16.msrb.mxu3 %v1862_v40 }
 0x230   : > { %v1423_v41 = vpop.f32.mrf.mxu2  ;;  %v1448_v42 = vpop.f32.mrf.mxu3 }
 0x27a   : > { %v1482_v43 = vpop.f32.mrf.mxu0  ;;  %v1501_v44 = vpop.f32.mrf.mxu1 }
 0x27b   : > { %v1620_v45 = vsel %vm1619_vm8, %v1482_v43, -inf  ;;  %v1623_v48 = vsel %vm1619_vm8, %v1501_v44, -inf }
 0x27c   : > { %1621 = vmax.xlane.f32.xlu2 %v1620_v45 }
 0x282   : > { %v1484_v46 = vpop.f32.mrf.mxu0  ;;  %v1503_v47 = vpop.f32.mrf.mxu1 }
 0x284   : > { %1624 = vmax.xlane.f32.xlu2 %v1623_v48 }
 0x286   : > { %v1520_v49 = vpop.f32.mrf.mxu2  ;;  %v1539_v50 = vpop.f32.mrf.mxu3 }
 0x287   : > { %v1626_v51 = vsel %vm1619_vm8, %v1520_v49, -inf  ;;  %v1629_v57 = vsel %vm1619_vm8, %v1539_v50, -inf }
 0x288   : > { %1627 = vmax.xlane.f32.xlu1 %v1626_v51 }
 0x28a   : > { %v1558_v52 = vpop.f32.mrf.mxu0  ;;  %v3391_v53 = vpop.f32.mrf.mxu1 }
 0x28b   : > { %v1632_v54 = vsel %vm1619_vm8, %v1558_v52, -inf  ;;  %v1635_v3 = vsel %vm1619_vm8, %v3391_v53, -inf }
 0x28c   : > { %1633 = vmax.xlane.f32.xlu2 %v1632_v54 }
 0x28e   : > { %v1522_v55 = vpop.f32.mrf.mxu2  ;;  %v1541_v56 = vpop.f32.mrf.mxu3 }
 0x290   : > { %1630 = vmax.xlane.f32.xlu1 %v1629_v57 }
 0x292   : > { %v1560_v58 = vpop.f32.mrf.mxu0  ;;  %v1579_v59 = vpop.f32.mrf.mxu1 }
 0x296   : > { %v1596_v60 = vpop.f32.mrf.mxu2  ;;  %v1615_v61 = vpop.f32.mrf.mxu3 }
 0x297   : > { %v1641_v62 = vsel %vm1619_vm8, %v1615_v61, -inf  ;;  %v1638_v63 = vsel %vm1619_vm8, %v1596_v60, -inf }
 0x298   : > { %1642 = vmax.xlane.f32.xlu1 %v1641_v62  ;;  %1639 = vmax.xlane.f32.xlu0 %v1638_v63 }
 0x29e   : > { %v1598_v0 = vpop.f32.mrf.mxu2  ;;  %v1617_v2 = vpop.f32.mrf.mxu3 }
 0x2a0   : > { %1636 = vmax.xlane.f32.xlu0 %v1635_v3 }
 0x2ef   : > { %v1622_v4 = vpop.xlane.xlu2 %1621 }
 0x2f0   : > { %v1644_v5 = vsub.f32 %v1482_v43, %v1622_v4 }
 0x2f2   : > { %v1652_v6 = vmul.f32 1.442695, %v1644_v5 }
 0x2f4   : > { %2883 = vpow2.f32 %v1652_v6 }
 0x2f7   : > { %v1625_v7 = vpop.xlane.xlu2 %1624 }
 0x2f8   : > { %v1645_v13 = vsub.f32 %v1501_v44, %v1625_v7 }
 0x2fa   : > { %v2884_v8 = vpop.eup %2883  ;;  %v1654_v15 = vmul.f32 1.442695, %v1645_v13 }
 0x2fb   : > { %v1628_v10 = vpop.xlane.xlu1 %1627  ;;  %v1668_v11 = vsel %vm1619_vm8, %v2884_v8, 0.0 }
 0x2fc   : > { %v1646_v12 = vsub.f32 %v1520_v49, %v1628_v10  ;;  %1669 = vadd.xlane.f32.xlu0 %v1668_v11 }
 0x2fe   : > { %v1656_v14 = vmul.f32 1.442695, %v1646_v12 }
 0x2ff   : > { %v1634_v16 = vpop.xlane.xlu2 %1633 }
 0x300   : > { %2885 = vpow2.f32 %v1656_v14  ;;  %v1648_v20 = vsub.f32 %v1558_v52, %v1634_v16 }
 0x301   : > { %2887 = vpow2.f32 %v1654_v15  ;;  %v839_v15 = vld [vmem:[%s3602_s24] sm:$0x3] }
 0x302   : > { %v1660_v23 = vmul.f32 1.442695, %v1648_v20  ;;  %v1890_v16 = vsel %vm1888_vm9, %v839_v15, 0 }
 0x303   : > { %v1631_v17 = vpop.xlane.xlu1 %1630 }
 0x304   : > { %v1647_v18 = vsub.f32 %v1539_v50, %v1631_v17  ;;  %v841_v17 = vld [vmem:[%s3602_s24 + $0x4] sm:$0x3] }
 0x306   : > { %v2886_v19 = vpop.eup %2885  ;;  %v1658_v21 = vmul.f32 1.442695, %v1647_v18  ;;  %v1928_v18 = vsel %vm1888_vm9, %v841_v17, 0 }
 0x307   : > { %v1674_v22 = vsel %vm1619_vm8, %v2886_v19, 0.0  ;;  %v2888_v26 = vpop.eup %2887 }
 0x308   : > { %2889 = vpow2.f32 %v1658_v21  ;;  %1675 = vadd.xlane.f32.xlu1 %v1674_v22  ;;  %v1671_v32 = vsel %vm1619_vm8, %v2888_v26, 0.0  ;;  %v842_v21 = vld [vmem:[%s3602_s24 + $0x6] sm:$0x3] }
 0x309   : > { %2891 = vpow2.f32 %v1660_v23  ;;  %v1947_v22 = vsel %vm1888_vm9, %v842_v21, 0  ;;  %v843_v23 = vld [vmem:[%s3602_s24 + $0x8] sm:$0x3] }
 0x30b   : > { %v1643_v24 = vpop.xlane.xlu1 %1642  ;;  %v1640_v25 = vpop.xlane.xlu0 %1639 }
 0x30c   : > { %v1651_v27 = vsub.f32 %v1615_v61, %v1643_v24  ;;  %v1650_v28 = vsub.f32 %v1596_v60, %v1640_v25  ;;  %v1966_v24 = vsel %vm1888_vm9, %v843_v23, 0  ;;  %v2874_v23 = vld [vmem:[%s3603_s28] ss:$0 sm:$0xff] }
 0x30e   : > { %v2890_v29 = vpop.eup %2889  ;;  %v1666_v30 = vmul.f32 1.442695, %v1651_v27  ;;  %v1664_v31 = vmul.f32 1.442695, %v1650_v28  ;;  %v845_v27 = vld [vmem:[%s3602_s24 + $0xc] sm:$0x3] }
 0x30f   : > { %v1677_v33 = vsel %vm1619_vm8, %v2890_v29, 0.0  ;;  %v2892_v35 = vpop.eup %2891  ;;  %v2004_v28 = vsel %vm1888_vm9, %v845_v27, 0 }
 0x310   : > { %2893 = vpow2.f32 %v1666_v30  ;;  %1672 = vadd.xlane.f32.xlu1 %v1671_v32  ;;  %1678 = vadd.xlane.f32.xlu2 %v1677_v33  ;;  %v1680_v41 = vsel %vm1619_vm8, %v2892_v35, 0.0 }
 0x311   : > { %2895 = vpow2.f32 %v1664_v31  ;;  %v846_v31 = vld [vmem:[%s3602_s24 + $0xe] sm:$0x3] }
 0x312   : > { %v2023_v33 = vsel %vm1888_vm9, %v846_v31, 0 }
 0x313   : > { %v1637_v34 = vpop.xlane.xlu0 %1636 }
 0x314   : > { %v1649_v36 = vsub.f32 %v3391_v53, %v1637_v34 }
 0x316   : > { %v2894_v37 = vpop.eup %2893  ;;  %v1662_v38 = vmul.f32 1.442695, %v1649_v36 }
 0x317   : > { %v2896_v39 = vpop.eup %2895  ;;  %v1689_v40 = vsel %vm1619_vm8, %v2894_v37, 0.0 }
 0x318   : > { %2897 = vpow2.f32 %v1662_v38  ;;  %1690 = vadd.xlane.f32.xlu0 %v1689_v40  ;;  %v1686_v42 = vsel %vm1619_vm8, %v2896_v39, 0.0  ;;  %1681 = vadd.xlane.f32.xlu1 %v1680_v41 }
 0x319   : > { %1687 = vadd.xlane.f32.xlu2 %v1686_v42 }
 0x31e   : > { %v2898_v43 = vpop.eup %2897 }
 0x31f   : > { %v1683_v44 = vsel %vm1619_vm8, %v2898_v43, 0.0 }
 0x321   : > { %1684 = vadd.xlane.f32.xlu2 %v1683_v44 }
 0x36f   : > { %v1670_v45 = vpop.xlane.xlu0 %1669 }
 0x370   : > { %2899 = vrcp.f32 %v1670_v45 }
 0x376   : > { %v2900_v46 = vpop.eup %2899 }
 0x377   : > { %v1700_v47 = vmul.f32 %v2900_v46, %v2884_v8 }
 0x379   : > { %v1708_v48 = vpack.c.bf16 %v1700_v47, %v1700_v47 }
 0x37b   : > { %v1676_v49 = vpop.xlane.xlu1 %1675  ;;  %2693 = vmatmul.msk.bf16.vlgmr.msra.gmra.mxu0 %vm1619_vm8, %v1708_v48 }
 0x37c   : > { %2901 = vrcp.f32 %v1676_v49  ;;  %1899 = vmatpush.bf16.msra.mxu0 %v1890_v16 }
 0x382   : > { %v2902_v50 = vpop.eup %2901 }
 0x383   : > { %v1702_v51 = vmul.f32 %v2902_v50, %v2886_v19  ;;  %v1673_v52 = vpop.xlane.xlu1 %1672  ;;  %v1679_v53 = vpop.xlane.xlu2 %1678  ;;  %v840_v19 = vld [vmem:[%s3602_s24 + $0x2] sm:$0x3] }
 0x384   : > { %2903 = vrcp.f32 %v1673_v52  ;;  %v1909_v20 = vsel %vm1888_vm9, %v840_v19, 0 }
 0x385   : > { %v1710_v54 = vpack.c.bf16 %v1702_v51, %v1702_v51  ;;  %2905 = vrcp.f32 %v1679_v53 }
 0x387   : > { %2695 = vmatmul.msk.bf16.vlgmr.msra.gmra.mxu2 %vm1619_vm8, %v1710_v54 }
 0x388   : > { %1937 = vmatpush.bf16.msra.mxu2 %v1928_v18 }
 0x38a   : > { %v2904_v55 = vpop.eup %2903 }
 0x38b   : > { %v2906_v56 = vpop.eup %2905  ;;  %v1701_v57 = vmul.f32 %v2904_v55, %v2888_v26  ;;  %v1682_v58 = vpop.xlane.xlu1 %1681 }
 0x38c   : > { %v1703_v59 = vmul.f32 %v2906_v56, %v2890_v29  ;;  %v1688_v60 = vpop.xlane.xlu2 %1687  ;;  %2907 = vrcp.f32 %v1682_v58  ;;  %v1691_v63 = vpop.xlane.xlu0 %1690  ;;  %v844_v29 = vld [vmem:[%s3602_s24 + $0xa] sm:$0x3] }
 0x38d   : > { %v1709_v61 = vpack.c.bf16 %v1701_v57, %v1701_v57  ;;  %2909 = vrcp.f32 %v1688_v60  ;;  %v1985_v30 = vsel %vm1888_vm9, %v844_v29, 0 }
 0x38e   : > { %v1711_v62 = vpack.c.bf16 %v1703_v59, %v1703_v59  ;;  %2911 = vrcp.f32 %v1691_v63 }
 0x38f   : > { %2694 = vmatmul.msk.bf16.vlgmr.msra.gmra.mxu1 %vm1619_vm8, %v1709_v61 }
 0x390   : > { %2696 = vmatmul.msk.bf16.vlgmr.msra.gmra.mxu3 %vm1619_vm8, %v1711_v62  ;;  %1918 = vmatpush.bf16.msra.mxu1 %v1909_v20 }
 0x391   : > { %1956 = vmatpush.bf16.msra.mxu3 %v1947_v22 }
 0x392   : > { %v2908_v0 = vpop.eup %2907 }
 0x393   : > { %v2910_v2 = vpop.eup %2909  ;;  %v1704_v3 = vmul.f32 %v2908_v0, %v2892_v35 }
 0x394   : > { %v1685_v4 = vpop.xlane.xlu2 %1684  ;;  %v1706_v5 = vmul.f32 %v2910_v2, %v2896_v39  ;;  %v2912_v7 = vpop.eup %2911 }
 0x395   : > { %2913 = vrcp.f32 %v1685_v4  ;;  %v1712_v6 = vpack.c.bf16 %v1704_v3, %v1704_v3  ;;  %v1707_v10 = vmul.f32 %v2912_v7, %v2894_v37 }
 0x396   : > { %v1714_v8 = vpack.c.bf16 %v1706_v5, %v1706_v5 }
 0x397   : > { %2697 = vmatmul.msk.bf16.vlgmr.msrb.gmra.mxu0 %vm1619_vm8, %v1712_v6  ;;  %v1715_v13 = vpack.c.bf16 %v1707_v10, %v1707_v10 }
 0x398   : > { %2699 = vmatmul.msk.bf16.vlgmr.msrb.gmra.mxu2 %vm1619_vm8, %v1714_v8  ;;  %1975 = vmatpush.bf16.msrb.mxu0 %v1966_v24 }
 0x399   : > { %2013 = vmatpush.bf16.msrb.mxu2 %v2004_v28 }
 0x39b   : > { %v2914_v11 = vpop.eup %2913 }
 0x39c   : > { %v1705_v12 = vmul.f32 %v2914_v11, %v2898_v43 }
 0x39e   : > { %v1713_v14 = vpack.c.bf16 %v1705_v12, %v1705_v12 }
 0x3a0   : > { %2698 = vmatmul.msk.bf16.vlgmr.msrb.gmra.mxu1 %vm1619_vm8, %v1713_v14  ;;  %2700 = vmatmul.msk.bf16.vlgmr.msrb.gmra.mxu3 %vm1619_vm8, %v1715_v13 }
 0x3a1   : > { %1994 = vmatpush.bf16.msrb.mxu1 %v1985_v30  ;;  %2032 = vmatpush.bf16.msrb.mxu3 %v2023_v33  ;;  %v2795_v33 = vld [vmem:[%s3217_s5 + $0x8] sm:$0xff] }
 0x3f8   : > { %v1740_v25 = vpop.f32.mrf.mxu0 }
 0x3f9   : > { %v1877_v26 = vpack.c.bf16 %v1740_v25, %v1740_v25 }
 0x3fb   : > { %2701 = vmatmul.msk.bf16.vlgmr.msra.gmra.mxu0 %vm1466_vm6, %v1877_v26 }
 0x3fc   : > { %2121 = vmatpush.bf16.msra.mxu0 %v2795_v33 }
 0x400   : > { %v1742_v32 = vpop.f32.mrf.mxu0 }
 0x40a   : > { %v1778_v34 = vpop.f32.mrf.mxu2 }
 0x40b   : > { %v1879_v35 = vpack.c.bf16 %v1778_v34, %v1778_v34 }
 0x40c   : > { %v1759_v36 = vpop.f32.mrf.mxu1 }
 0x40d   : > { %v1878_v37 = vpack.c.bf16 %v1759_v36, %v1759_v36  ;;  %2703 = vmatmul.msk.bf16.vlgmr.msra.gmra.mxu2 %vm1466_vm6, %v1879_v35 }
 0x40f   : > { %2702 = vmatmul.msk.bf16.vlgmr.msra.gmra.mxu1 %vm1466_vm6, %v1878_v37 }
 0x412   : > { %v1780_v38 = vpop.f32.mrf.mxu2 }
 0x413   : > { %v1797_v39 = vpop.f32.mrf.mxu3 }
 0x414   : > { %v1880_v40 = vpack.c.bf16 %v1797_v39, %v1797_v39  ;;  %v1761_v41 = vpop.f32.mrf.mxu1  ;;  %v1816_v42 = vpop.f32.mrf.mxu0 }
 0x415   : > { %v1881_v43 = vpack.c.bf16 %v1816_v42, %v1816_v42 }
 0x416   : > { %2704 = vmatmul.msk.bf16.vlgmr.msra.gmra.mxu3 %vm1466_vm6, %v1880_v40 }
 0x417   : > { %2705 = vmatmul.msk.bf16.vlgmr.msrb.gmra.mxu0 %vm1466_vm6, %v1881_v43 }
 0x41b   : > { %v1799_v44 = vpop.f32.mrf.mxu3  ;;  %v1854_v45 = vpop.f32.mrf.mxu2 }
 0x41c   : > { %v1883_v46 = vpack.c.bf16 %v1854_v45, %v1854_v45  ;;  %v1818_v47 = vpop.f32.mrf.mxu0 }
 0x41d   : > { %v1835_v48 = vpop.f32.mrf.mxu1 }
 0x41e   : > { %v1882_v49 = vpack.c.bf16 %v1835_v48, %v1835_v48  ;;  %2707 = vmatmul.msk.bf16.vlgmr.msrb.gmra.mxu2 %vm1466_vm6, %v1883_v46 }
 0x420   : > { %2706 = vmatmul.msk.bf16.vlgmr.msrb.gmra.mxu1 %vm1466_vm6, %v1882_v49  ;;  %v2877_v49 = vld [vmem:[%s684_s6] ss:$0 sm:$0xff]  ;;  %s3606_s6 = sld [smem:[#allocation9_spill]] }
 0x423   : > { %v1873_v50 = vpop.f32.mrf.mxu3  ;;  %v1856_v51 = vpop.f32.mrf.mxu2 }
 0x424   : > { %v1884_v52 = vpack.c.bf16 %v1873_v50, %v1873_v50 }
 0x425   : > { %v1837_v53 = vpop.f32.mrf.mxu1 }
 0x426   : > { %2708 = vmatmul.msk.bf16.vlgmr.msrb.gmra.mxu3 %vm1466_vm6, %v1884_v52 }
 0x42b   : > { %v1875_v54 = vpop.f32.mrf.mxu3 }
 0x478   : > { %v1901_v55 = vpop.f32.mrf.mxu0 }
 0x479   : > { %v2038_v0 = vsel %vm704_vm1, %v1901_v55, 0.0 }
 0x480   : > { %v1903_v56 = vpop.f32.mrf.mxu0 }
 0x481   : > { %v2799_v56 = vld [vmem:[%s3231_s8 + $0x18] sm:$0xff] }
 0x482   : > { %2217 = vmatpush.bf16.msra.mxu1 %v2799_v56 }
 0x48c   : > { %v1920_v57 = vpop.f32.mrf.mxu1 }
 0x48d   : > { %v2039_v61 = vsel %vm704_vm1, %v1920_v57, 0.0 }
 0x48e   : > { %v2040_v3 = vadd.f32 %v2039_v61, %v2038_v0  ;;  %v2798_v61 = vld [vmem:[%s3231_s8 + $0x10] sm:$0xff] }
 0x48f   : > { %2218 = vmatpush.bf16.msra.mxu1 %v2798_v61 }
 0x490   : > { %v1939_v58 = vpop.f32.mrf.mxu2 }
 0x491   : > { %v2041_v2 = vsel %vm704_vm1, %v1939_v58, 0.0 }
 0x492   : > { %v2042_v5 = vadd.f32 %v2041_v2, %v2040_v3  ;;  %v2797_v3 = vld [vmem:[%s3231_s8 + $0x8] sm:$0xff] }
 0x493   : > { %2219 = vmatpush.bf16.msra.mxu1 %v2797_v3 }
 0x494   : > { %v1922_v59 = vpop.f32.mrf.mxu1  ;;  %v1977_v60 = vpop.f32.mrf.mxu0 }
 0x495   : > { %v2045_v11 = vsel %vm704_vm1, %v1977_v60, 0.0 }
 0x498   : > { %v1941_v62 = vpop.f32.mrf.mxu2 }
 0x499   : > { %v1958_v63 = vpop.f32.mrf.mxu3 }
 0x49a   : > { %v2043_v4 = vsel %vm704_vm1, %v1958_v63, 0.0 }
 0x49b   : > { %v2044_v8 = vadd.f32 %v2043_v4, %v2042_v5 }
 0x49c   : > { %v1979_v6 = vpop.f32.mrf.mxu0 }
 0x49d   : > { %v1996_v7 = vpop.f32.mrf.mxu1  ;;  %v2046_v13 = vadd.f32 %v2045_v11, %v2044_v8 }
 0x49e   : > { %v2047_v14 = vsel %vm704_vm1, %v1996_v7, 0.0  ;;  %v2796_v7 = vld [vmem:[%s3231_s8] sm:$0xff]  ;;  %s3607_s8 = sld [smem:[#allocation6_spill]] }
 0x49f   : > { %v2048_v17 = vadd.f32 %v2047_v14, %v2046_v13  ;;  %2220 = vmatpush.bf16.msra.mxu1 %v2796_v7 }
 0x4a1   : > { %v1960_v10 = vpop.f32.mrf.mxu3  ;;  %v2015_v12 = vpop.f32.mrf.mxu2 }
 0x4a2   : > { %v2049_v16 = vsel %vm704_vm1, %v2015_v12, 0.0 }
 0x4a3   : > { %v2050_v18 = vadd.f32 %v2049_v16, %v2048_v17 }
 0x4a4   : > { %s3610_s28 = sand.u32 1, %s3607_s8  }
 0x4a5   : > { %v1998_v15 = vpop.f32.mrf.mxu1  ;;  %s2229_s15 = scalar_lea.sflag [#allocation3], %s3610_s28 }
 0x4a9   : > { %v2034_v19 = vpop.f32.mrf.mxu3  ;;  %v2017_v20 = vpop.f32.mrf.mxu2 }
 0x4aa   : > { %v2051_v21 = vsel %vm704_vm1, %v2034_v19, 0.0 }
 0x4ab   : > { %v2052_v22 = vadd.f32 %v2051_v21, %v2050_v18 }
 0x4ad   : > { %v2053_v24 = vadd.f32 %v2052_v22, %v3238_v1  ;;  %v2794_v1 = vld [vmem:[%s3217_s5] sm:$0xff]  ;;  %s3605_s5 = scalar_lea.vmem %s3604_s14, %s3167_s26 }
 0x4ae   : > { %2122 = vmatpush.bf16.msra.mxu0 %v2794_v1  ;;  %v2875_v43 = vld [vmem:[%s3605_s5] ss:$0 sm:$0xff]  ;;  %s2939_s5 = scalar_lea.hbm %s3609_s12, 16 }
 0x4af   : > { %v3454_v25 = vadd.f32 %v2874_v23, %v2053_v24 }
 0x4b1   : > { %v2036_v26 = vpop.f32.mrf.mxu3  ;;  %v2061_v27 = vsel %vm704_vm1, %v3454_v25, 0.0 }
 0x4b2   : > { %2062 = vadd.xlane.f32.xlu0 %v2061_v27 }
 0x525   : > { %v2063_v28 = vpop.xlane.xlu0 %2062 }
 0x526   : > { %v2064_v29 = vmul.f32 %v2063_v28, %v3242_v9 }
 0x528   : > { %v2065_v30 = vsub.f32 %v3454_v25, %v2064_v29 }
 0x52a   : > { %v2066_v31 = vmul.f32 %v2065_v30, %v2065_v30 }
 0x52c   : > { %v2067_v32 = vsel %vm704_vm1, %v2066_v31, 0.0 }
 0x52d   : > { %2068 = vadd.xlane.f32.xlu1 %v2067_v32 }
 0x5a0   : > { %v2069_v34 = vpop.xlane.xlu1 %2068 }
 0x5a1   : > { %v2070_v35 = vmul.f32 %v2069_v34, %v3242_v9  ;;  %v2876_v9 = vld [vmem:[%s676_s27] ss:$0 sm:$0xff]  ;;  %s2737_s27 = sshll.u32 %s3606_s6, 3 }
 0x5a2   : > { %s2239_s24 = scalar_lea.hbm %s3609_s12, %s2737_s27 }
 0x5a3   : > { %v2071_v36 = vadd.f32 1e-05, %v2070_v35  ;;  %v2878_v35 = vld [vmem:[%s692_s17] ss:$0 sm:$0xff]  ;;  %s2243_s25 = sshll.u32 %s2239_s24, 4  ;;  %s2244_s25 = int_to_ptr.hbm [resolvable:$true] %s2243_s25 }
 0x5a4   : > { %s2933_s29 = sshra.s32 %s2244_s25, 4  ;;  %s2934_s29 = int_to_ptr.hbm [resolvable:$true] %s2933_s29 }
 0x5a5   : > { %2915 = vrsqrt.f32 %v2071_v36  ;;  %vm2078_vm11 = vweird.f32 %v2071_v36  ;;  %s2935_s26 = scalar_lea.hbm %s2934_s29, 8  ;;  %p2940_p5 = scmp.lt.s32.totalorder %s2934_s29, %s3609_s12 }
 0x5a6   : > { %p2936_p1 = scmp.ne.s32.totalorder %s2934_s29, %s2935_s26  ;;  %p2941_p6 = scmp.lt.s32.totalorder %s2939_s5, %s2935_s26 }
 0x5a8   : > { %p2937_p2 = pnand %p2936_p1, %p3140_p3  ;;  %p2942_p7 = por %p2941_p6, %p2940_p5 }
 0x5aa   : > { %p2938_p4 = pneg %p2937_p2 }
 0x5ab   : > { %v2916_v37 = vpop.eup %2915 }
 0x5ac   : > { %v2073_v38 = vmul.f32 %v2916_v37, %v2071_v36  ;;  %vm2079_vm10 = vweird.f32 %v2916_v37  ;;  %p2943_p8 = pnand %p2942_p7, %p2938_p4 }
 0x5ad   : > { %vm2080_vm12 = vmor %vm2078_vm11, %vm2079_vm10 }
 0x5ae   : > { %v2074_v39 = vmul.f32 %v2916_v37, %v2073_v38 }
 0x5b0   : > { %v2075_v40 = vmul.f32 0.5, %v2074_v39 }
 0x5b2   : > { %v2076_v41 = vsub.f32 1.5, %v2075_v40 }
 0x5b4   : > { %v2077_v42 = vmul.f32 %v2916_v37, %v2076_v41 }
 0x5b6   : > { %v2081_v44 = vsel %vm2080_vm12, %v2916_v37, %v2077_v42 }
 0x5b7   : > { %v2082_v45 = vmul.f32 %v2081_v44, %v2065_v30 }
 0x5b9   : > { %v2086_v46 = vmul.f32 %v2875_v43, %v2082_v45 }
 0x5bb   : > { %v2090_v47 = vadd.f32 %v2876_v9, %v2086_v46 }
 0x5bd   : > { %v2091_v48 = vpack.c.bf16 %v2090_v47, %v2090_v47 }
 0x5bf   : > { %2717 = vmatmul.msk.bf16.vlgmr.msra.gmra.mxu0 %vm704_vm1, %v2091_v48 }
 0x63c   : > { %v2124_v50 = vpop.f32.mrf.mxu0 }
 0x63d   : > { %v2125_v51 = vadd.f32 %v2877_v49, %v2124_v50 }
 0x63f   : > { %v2129_v52 = vmul.f32 0.70710677, %v2125_v51  ;;  %v2128_v32 = vmul.f32 0.5, %v2125_v51 }
 0x641   : > { %v2130_v53 = vmul.f32 %v2129_v52, %v2129_v52 }
 0x643   : > { %v2131_v54 = vmin.f32 %v2130_v53, 16.0 }
 0x644   : > { %v2126_v55 = vpop.f32.mrf.mxu0 }
 0x645   : > { %v2132_v57 = vmul.f32 2.1237322e-06, %v2131_v54  ;;  %v2143_v58 = vmul.f32 3.8918573e-05, %v2131_v54 }
 0x647   : > { %v2133_v59 = vadd.f32 0.00028619796, %v2132_v57  ;;  %v2144_v60 = vadd.f32 0.001143296, %v2143_v58 }
 0x649   : > { %v2134_v62 = vmul.f32 %v2133_v59, %v2131_v54  ;;  %v2145_v63 = vmul.f32 %v2144_v60, %v2131_v54 }
 0x64b   : > { %v2146_v0 = vadd.f32 0.014752088, %v2145_v63  ;;  %v2135_v2 = vadd.f32 0.0036580483, %v2134_v62 }
 0x64d   : > { %v2147_v4 = vmul.f32 %v2146_v0, %v2131_v54  ;;  %v2136_v6 = vmul.f32 %v2135_v2, %v2131_v54 }
 0x64f   : > { %v2148_v5 = vadd.f32 0.112945676, %v2147_v4  ;;  %v2137_v11 = vadd.f32 0.05243302, %v2136_v6 }
 0x651   : > { %v2149_v8 = vmul.f32 %v2148_v5, %v2131_v54  ;;  %v2138_v14 = vmul.f32 %v2137_v11, %v2131_v54 }
 0x653   : > { %v2150_v10 = vadd.f32 0.4994258, %v2149_v8  ;;  %v2139_v15 = vadd.f32 0.18741608, %v2138_v14 }
 0x655   : > { %v2151_v12 = vmul.f32 %v2150_v10, %v2131_v54  ;;  %v2140_v17 = vmul.f32 %v2139_v15, %v2131_v54 }
 0x657   : > { %v2152_v13 = vadd.f32 1.0, %v2151_v12  ;;  %v2141_v21 = vadd.f32 1.1283791, %v2140_v17 }
 0x659   : > { %2917 = vrcp.f32 %v2152_v13  ;;  %v2164_v20 = vand.u32 2147483648, %v2152_v13  ;;  %v2162_v23 = vand.u32 2147483647, %v2152_v13  ;;  %vm2158_vm14 = vweird.f32 %v2152_v13 }
 0x65a   : > { %v2142_v27 = vmul.f32 %v2141_v21, %v2129_v52 }
 0x65b   : > { %v2165_v26 = vor.u32 1.1754944e-38, %v2164_v20  ;;  %vm2163_vm0 = vcmp.eq.f32.partialorder %v2162_v23, 8.507059e+37 }
 0x65f   : > { %v2918_v16 = vpop.eup %2917 }
 0x660   : > { %v2154_v18 = vmul.f32 %v2918_v16, %v2152_v13  ;;  %vm2159_vm13 = vweird.f32 %v2918_v16 }
 0x661   : > { %vm2160_vm15 = vmor %vm2158_vm14, %vm2159_vm13 }
 0x662   : > { %v2155_v19 = vsub.f32 1.0, %v2154_v18 }
 0x664   : > { %v2156_v22 = vmul.f32 %v2918_v16, %v2155_v19 }
 0x666   : > { %v2157_v24 = vadd.f32 %v2918_v16, %v2156_v22 }
 0x668   : > { %v2161_v28 = vsel %vm2160_vm15, %v2918_v16, %v2157_v24 }
 0x669   : > { %v2166_v29 = vsel %vm2163_vm0, %v2165_v26, %v2161_v28 }
 0x66a   : > { %v2167_v30 = vmul.f32 %v2166_v29, %v2142_v27 }
 0x66c   : > { %v2718_v31 = vclamps-f32 %v2167_v30, 1.0 }
 0x66e   : > { %v2170_v33 = vadd.f32 1.0, %v2718_v31 }
 0x670   : > { %v2171_v1 = vmul.f32 %v2170_v33, %v2128_v32 }
 0x672   : > { %v2172_v34 = vpack.c.bf16 %v2171_v1, %v2171_v1 }
 0x674   : > { %2735 = vmatmul.msk.bf16.vlgmr.msra.gmra.mxu1 %vm2209_vm2, %v2172_v34 }
 0x6f1   : > { %v2222_v36 = vpop.f32.mrf.mxu1 }
 0x6f2   : > { %v2223_v37 = vadd.f32 %v2878_v35, %v2222_v36 }
 0x6f4   : > { %v2226_v38 = vadd.f32 %v2223_v37, %v3454_v25 }
 0x6f6   : > { %2227 = vst.msk [vmem:[%s3233_s4] sm:$0xff] %vm704_vm1, %v2226_v38 }
 0x6f7   : > { %2946 = shalt.err (!%p2943_p8)
}
 0x6f8   : > { %2800 = dma.vmem_to_hbm [thread:$0]  (%p3140_p3), %s2242_s21, 128, %s2244_s25, %s2229_s15  }
 0x6f9   : > { %v2224_v25 = vpop.f32.mrf.mxu1 }
 0x6fa PF: > { %s3611_s4 = sld [smem:[#allocation12_spill]] }
 0x6fb   : > { %s3612_s3 = sld [smem:[#allocation5_spill]] }
 0x700   : > { %p2806_p10 = scmp.ge.s32.totalorder %s3611_s4, 2 }
 0x701   : > { %s2255_s6 = sand.u32 1, %s3612_s3  }
 0x702   : > { %p2803_p11 = pnand %p2806_p10, %p3150_p9  ;;  %s2256_s8 = scalar_lea.sflag [#allocation3], %s2255_s6 }
 0x704   : > { %p2804_p12 = pneg %p2803_p11 }
 0x706   : > { %2980 = dma.done.wait (%p2804_p12), %s2256_s8, 128  }
 0x707   : > { %2982 = vsyncadd (%p2804_p12), %s2256_s8, 4294967168  ;;  %s27_s20 = sadd.s32 1, %s3611_s4   ;;  %s3614_s29 = sld [smem:[#allocation6_spill]] }
 0x708   : > { %p24_p13 = scmp.ge.s32.totalorder %s27_s20, 6   ;;  %s3615_s30 = sld [smem:[#allocation7_spill]] }
 0x709   : > { %s3616_s15 = sld [smem:[#allocation17_spill]] }
 0x70a   : > { %s3617_s16 = sld [smem:[#allocation10_spill]]  ;;  %26 = sbr.rel (!%p24_p13) target bundleno = 14 (0xe), region = 154 }
 0x70b   : > { %s3618_s17 = sld [smem:[#allocation11_spill]] }
 0x70c   : > { %s3619_s18 = sld [smem:[#allocation13_spill]] }
 0x70d   : > { %s3620_s19 = sld [smem:[#allocation15_spill]] }
 0x70f   :  { %2262 = vsyncpa [#allocation3], 1 }
 0x710   :  { %2264 = vsyncpa [#allocation3 + $0x1], 1 }

</bundles_post_ra>
